<compile_context>
chip_gen: v5e
topology: v5e:2x2
jax: 0.10.0
libtpu: 0.0.40
codegen_flags: <defaults>
</compile_context>

<pallas_src>
import functools

import jax
import jax.numpy as jnp
import numpy as np
from jax.experimental import pallas as pl
from jax.experimental.pallas import tpu as pltpu

_LANE = 128
_SUBLANE = 8


def _round_up(x, m):
    return ((x + m - 1) // m) * m


def _pad2d(a, rows, cols):
    r, c = a.shape
    return jnp.pad(a, ((0, rows - r), (0, cols - c)))


def _vmem_limit_bytes():
    """Generation-aware scoped-VMEM limit (headroom below physical VMEM)."""
    cap = None
    try:
        cap = int(pltpu.get_tpu_info().vmem_capacity_bytes)
    except Exception:
        cap = None
    if cap is None:
        try:
            kind = jax.devices()[0].device_kind.lower()
        except Exception:
            kind = ""
        if "v5" in kind or "v6" in kind:
            cap = 128 * 1024 * 1024
        else:
            cap = 64 * 1024 * 1024          # conservative (v7x: 64 MiB / TC)
    return min(int(cap * 0.80), 100 * 1024 * 1024)


# ----------------------------------------------------------------------------
# Kernel 1: three fused NGNNLayer(order=2) passes -> z_hat (all in VMEM)
# ----------------------------------------------------------------------------
def _decoder_layers_kernel(z_ref, adj_ref,
                           w12_4, fc_4, w12_5, fc_5, w12_6, fc_6,
                           z_hat_ref, *, layer_dims, inv_n, compute_dtype):
    adj = adj_ref[...]                                     # (Np, Np) compute_dtype

    def ngnn_layer(x, w12_ref, fc_ref, out_f, r, active):
        w12 = w12_ref[...]                                 # (Fin_p, 2*Fout_p)
        out_p = w12.shape[1] // 2
        # Both branch matmuls fused into one wide MXU pass: x @ [W1 | W2].
        h = jnp.dot(x, w12, preferred_element_type=jnp.float32)
        if active:
            h = jnp.tanh(h)
        # One adj @ [h1 | h2] gives both order-1 results together.
        h = jnp.dot(adj, h.astype(compute_dtype),
                    preferred_element_type=jnp.float32)
        h1 = h[:, :out_p]                                  # adj   @ act(x@W1)
        h2 = jnp.dot(adj, h[:, out_p:].astype(compute_dtype),
                     preferred_element_type=jnp.float32)   # adj^2 @ act(x@W2)

        # Attention over the order axis (softmax along dim 0, as in PyTorch).
        # Padded rows of h are exactly zero -> sum * (1/N_true) == true mean.
        m1 = jnp.sum(h1, axis=0, keepdims=True) * inv_n
        m2 = jnp.sum(h2, axis=0, keepdims=True) * inv_n
        feats = jnp.concatenate([m1, m2], axis=0)          # (2, Fout_p) f32
        # "Ones slot" in padded column `out_f` folds the fc1 bias into the matmul.
        col = jax.lax.broadcasted_iota(jnp.int32, feats.shape, 1)
        feats = jnp.where(col == out_f, 1.0, feats)
        fc1t = fc_ref[0]                                   # (r_p, Fout_p) = [fc1w.T | fc1b]
        a = jax.lax.dot_general(feats, fc1t, (((1,), (1,)), ((), ())),
                                preferred_element_type=jnp.float32)  # (2, r_p)
        a = jnp.maximum(a, 0.0)                            # ReLU
        # "Ones slot" in padded column `r` folds the fc2 bias into the matmul.
        acol = jax.lax.broadcasted_iota(jnp.int32, a.shape, 1)
        a = jnp.where(acol == r, 1.0, a)
        att = jnp.dot(a, fc_ref[1],                        # (2, Fout_p)
                      preferred_element_type=jnp.float32)
        att = jax.nn.softmax(att, axis=0)                  # softmax over order
        return h1 * att[0:1, :] + h2 * att[1:2, :]         # (Np, Fout_p) f32

    (o4, r4), (o5, r5), (o6, r6) = layer_dims
    z = ngnn_layer(z_ref[...], w12_4, fc_4, o4, r4, True)
    z = ngnn_layer(z.astype(compute_dtype), w12_5, fc_5, o5, r5, True)
    z_hat = ngnn_layer(z.astype(compute_dtype), w12_6, fc_6, o6, r6, False)
    z_hat_ref[...] = z_hat


# ----------------------------------------------------------------------------
# Kernel 2: row-tiled sigmoid(z_hat @ z_hat.T)   (parallel grid, lane-dense out)
# ----------------------------------------------------------------------------
def _zzt_sigmoid_kernel(z_row_ref, z_full_ref, out_ref, *, compute_dtype):
    zr = z_row_ref[...].astype(compute_dtype)              # (tm,  F3_p)
    zf = z_full_ref[...].astype(compute_dtype)              # (N_p, F3_p), resident
    s = jax.lax.dot_general(zr, zf, (((1,), (1,)), ((), ())),
                            preferred_element_type=jnp.float32)
    out_ref[...] = jax.nn.sigmoid(s).astype(out_ref.dtype)


# ----------------------------------------------------------------------------
# One-time weight packing (outside the per-call path)
# ----------------------------------------------------------------------------
def _prepare_layer(layer_params, in_p, compute_dtype):
    w1, w2, fc1w, fc1b, fc2w, fc2b = layer_params
    in_f, out_f = w1.shape
    r = fc1w.shape[1]
    # +1 guarantees a zero padded column/row reserved for the bias "ones slot".
    out_p = _round_up(out_f + 1, _LANE)
    r_p = _round_up(r + 1, _SUBLANE)

    w12 = jnp.zeros((in_p, 2 * out_p), jnp.float32)
    w12 = w12.at[:in_f, :out_f].set(w1)
    w12 = w12.at[:in_f, out_p:out_p + out_f].set(w2)
    w12 = w12.astype(compute_dtype)

    fc = jnp.zeros((2, r_p, out_p), jnp.float32)            # one slab per layer
    fc = fc.at[0, :r, :out_f].set(fc1w.T)                   # fc1 weight (transposed)
    fc = fc.at[0, :r, out_f].set(fc1b[0])                   # fc1 bias (ones-slot col)
    fc = fc.at[1, :r, :out_f].set(fc2w)                     # fc2 weight
    fc = fc.at[1, r, :out_f].set(fc2b[0])                   # fc2 bias (ones-slot row)
    return (w12, fc), out_p, (out_f, r)


def prepare_decoder_params(params, compute_dtype=jnp.bfloat16):
    p4, p5, p6 = params
    in_p = _round_up(p4[0].shape[0], _LANE)
    (w12_4, fc_4), out_p4, d4 = _prepare_layer(p4, in_p, compute_dtype)
    (w12_5, fc_5), out_p5, d5 = _prepare_layer(p5, out_p4, compute_dtype)
    (w12_6, fc_6), out_p6, d6 = _prepare_layer(p6, out_p5, compute_dtype)
    return dict(weights=(w12_4, fc_4, w12_5, fc_5, w12_6, fc_6),
                layer_dims=(d4, d5, d6),
                in_p=in_p, f3=d6[0], f3_p=out_p6,
                compute_dtype=compute_dtype)


# ----------------------------------------------------------------------------
# Forward wrapper
# ----------------------------------------------------------------------------
def igae_decoder_forward(z_igae, adj, prepped, *, z_hat_adj_dtype=jnp.float32):
    # z_hat_adj_dtype=jnp.bfloat16 halves the dominant N^2 writeback (useful
    # on v7x's 64 MiB VMEM); default f32 preserves the module's output dtype.
    n, _ = z_igae.shape
    cdt = prepped["compute_dtype"]
    in_p, f3, f3_p = prepped["in_p"], prepped["f3"], prepped["f3_p"]
    n_p = _round_up(n, _LANE)          # lane-dense node dim: unmasked stores +
                                       # full MXU contraction depth on adj matmuls
    z_p = _pad2d(z_igae, n_p, in_p).astype(cdt)
    adj_p = _pad2d(adj, n_p, n_p).astype(cdt)

    vmem_limit = _vmem_limit_bytes()
    vmem = lambda: pl.BlockSpec(memory_space=pltpu.MemorySpace.VMEM)

    # ---- Call 1: three fused NGNN layers (gridless, all-in-VMEM). ----
    layers_kernel = functools.partial(
        _decoder_layers_kernel, layer_dims=prepped["layer_dims"],
        inv_n=1.0 / n, compute_dtype=cdt)
    z_hat_p = pl.pallas_call(
        layers_kernel,
        out_shape=jax.ShapeDtypeStruct((n_p, f3_p), jnp.float32),
        in_specs=[vmem() for _ in range(8)],
        out_specs=vmem(),
        compiler_params=pltpu.CompilerParams(vmem_limit_bytes=vmem_limit),
    )(z_p, adj_p, *prepped["weights"])

    # ---- Call 2: sigmoid(z_hat @ z_hat.T), row-tiled + core-parallel. ----
    tm = 256 if (n_p % 256 == 0) else _LANE
    zzt_kernel = functools.partial(_zzt_sigmoid_kernel, compute_dtype=cdt)
    z_hat_adj_p = pl.pallas_call(
        zzt_kernel,
        out_shape=jax.ShapeDtypeStruct((n_p, n_p), z_hat_adj_dtype),
        grid=(n_p // tm,),
        in_specs=[pl.BlockSpec((tm, f3_p), lambda i: (i, 0)),
                  pl.BlockSpec((n_p, f3_p), lambda i: (0, 0))],   # resident z_hat
        out_specs=pl.BlockSpec((tm, n_p), lambda i: (i, 0)),
        compiler_params=pltpu.CompilerParams(
            dimension_semantics=("parallel",),
            vmem_limit_bytes=vmem_limit),
    )(z_hat_p, z_hat_p)

    # Slice padding back off.
    return z_hat_p[:n, :f3], z_hat_adj_p[:n, :n]


# ----------------------------------------------------------------------------
# Parameter construction (deterministic, synthetic)
# ----------------------------------------------------------------------------
def _xavier_uniform(key, shape):
    fan_in, fan_out = shape
    bound = float(np.sqrt(6.0 / (fan_in + fan_out)))
    return jax.random.uniform(key, shape, jnp.float32, -bound, bound)


def make_ngnn_layer_params(key, in_features, out_features, reduction=4):
    """Weights for one NGNNLayer(order=2); Linear weights stored as (in, out)."""
    r = out_features // reduction
    k = jax.random.split(key, 6)
    w1 = _xavier_uniform(k[0], (in_features, out_features))   # order-1 branch
    w2 = _xavier_uniform(k[1], (in_features, out_features))   # order-2 branch
    fc1w = _xavier_uniform(k[2], (out_features, r))
    fc1b = jax.random.uniform(k[3], (1, r), jnp.float32, -0.1, 0.1)
    fc2w = _xavier_uniform(k[4], (r, out_features))
    fc2b = jax.random.uniform(k[5], (1, out_features), jnp.float32, -0.1, 0.1)
    return (w1, w2, fc1w, fc1b, fc2w, fc2b)


# ----------------------------------------------------------------------------
# Pure-JAX reference (mirrors the kernel's bf16-matmul / f32-accumulate casts)
# ----------------------------------------------------------------------------
def _ref_ngnn_layer(x, adj, layer_params, active, cdt):
    w1, w2, fc1w, fc1b, fc2w, fc2b = layer_params
    xc, adjc = x.astype(cdt), adj.astype(cdt)
    h1 = jnp.dot(xc, w1.astype(cdt), preferred_element_type=jnp.float32)
    h2 = jnp.dot(xc, w2.astype(cdt), preferred_element_type=jnp.float32)
    if active:
        h1, h2 = jnp.tanh(h1), jnp.tanh(h2)
    h1 = jnp.dot(adjc, h1.astype(cdt), preferred_element_type=jnp.float32)
    h2 = jnp.dot(adjc, h2.astype(cdt), preferred_element_type=jnp.float32)
    h2 = jnp.dot(adjc, h2.astype(cdt), preferred_element_type=jnp.float32)
    m = jnp.concatenate([h1.mean(0, keepdims=True), h2.mean(0, keepdims=True)], 0)
    a = jax.nn.softmax(jnp.maximum(m @ fc1w + fc1b, 0.0) @ fc2w + fc2b, axis=0)
    return h1 * a[0:1] + h2 * a[1:2]


def _ref_forward(z_igae, adj, params, cdt):
    p4, p5, p6 = params
    z = _ref_ngnn_layer(z_igae, adj, p4, True, cdt)
    z = _ref_ngnn_layer(z, adj, p5, True, cdt)
    z_hat = _ref_ngnn_layer(z, adj, p6, False, cdt)
    zc = z_hat.astype(cdt)
    s = jax.lax.dot_general(zc, zc, (((1,), (1,)), ((), ())),
                            preferred_element_type=jnp.float32)
    return z_hat, jax.nn.sigmoid(s)


# ----------------------------------------------------------------------------
if __name__ == "__main__":
    # Small shapes consistent with IGAE_decoder(gae_n_dec_1, _2, _3, n_input).
    N = 48                     # graph nodes
    gae_n_dec_1 = 8
    gae_n_dec_2 = 16
    gae_n_dec_3 = 32
    n_input = 16

    key = jax.random.PRNGKey(0)
    kz, kadj, k4, k5, k6 = jax.random.split(key, 5)

    z_igae = jax.random.normal(kz, (N, gae_n_dec_1), jnp.float32)
    # dense row-normalized adjacency (stand-in for the sparse adj in MGCN)
    adj_raw = jax.random.uniform(kadj, (N, N), jnp.float32)
    adj = adj_raw / jnp.sum(adj_raw, axis=1, keepdims=True)

    params = (
        make_ngnn_layer_params(k4, gae_n_dec_1, gae_n_dec_2),
        make_ngnn_layer_params(k5, gae_n_dec_2, gae_n_dec_3),
        make_ngnn_layer_params(k6, gae_n_dec_3, n_input),
    )

    # Pack / pad weights once (outside the per-call path).
    prepped = prepare_decoder_params(params, compute_dtype=jnp.bfloat16)

    z_hat, z_hat_adj = igae_decoder_forward(z_igae, adj, prepped)
    jax.block_until_ready((z_hat, z_hat_adj))

    # correctness check vs a cast-mirroring pure-JAX reference
    z_ref, zadj_ref = _ref_forward(z_igae, adj, params, jnp.bfloat16)
    assert z_hat.shape == (N, n_input)
    assert z_hat_adj.shape == (N, N)
    np.testing.assert_allclose(np.asarray(z_hat), np.asarray(z_ref),
                               rtol=1e-2, atol=1e-2)
    np.testing.assert_allclose(np.asarray(z_hat_adj), np.asarray(zadj_ref),
                               rtol=1e-2, atol=1e-2)

    print("KERNEL_OK")
</pallas_src>

<mosaic_0001>
module attributes {stable_mosaic.version = 11 : i64} {
  func.func @_decoder_layers_kernel(%arg0: memref<128x128xbf16, #tpu.memory_space<vmem>>, %arg1: memref<128x128xbf16, #tpu.memory_space<vmem>>, %arg2: memref<128x256xbf16, #tpu.memory_space<vmem>>, %arg3: memref<2x8x128xf32, #tpu.memory_space<vmem>>, %arg4: memref<128x256xbf16, #tpu.memory_space<vmem>>, %arg5: memref<2x16x128xf32, #tpu.memory_space<vmem>>, %arg6: memref<128x256xbf16, #tpu.memory_space<vmem>>, %arg7: memref<2x8x128xf32, #tpu.memory_space<vmem>>, %arg8: memref<128x128xf32, #tpu.memory_space<vmem>>) attributes {dimension_semantics = [], scalar_prefetch = 0 : i64, scratch_operands = 0 : i64, tpu.core_type = #tpu.core_type<tc>} {
    %c0 = arith.constant 0 : index
    %c0_0 = arith.constant 0 : index
    %0 = vector.load %arg1[%c0, %c0_0] : memref<128x128xbf16, #tpu.memory_space<vmem>>, vector<128x128xbf16>
    %c0_1 = arith.constant 0 : index
    %c0_2 = arith.constant 0 : index
    %1 = vector.load %arg0[%c0_1, %c0_2] : memref<128x128xbf16, #tpu.memory_space<vmem>>, vector<128x128xbf16>
    %c0_3 = arith.constant 0 : index
    %c0_4 = arith.constant 0 : index
    %2 = vector.load %arg2[%c0_3, %c0_4] : memref<128x256xbf16, #tpu.memory_space<vmem>>, vector<128x256xbf16>
    %cst = arith.constant dense<0.000000e+00> : vector<128x256xf32>
    %3 = tpu.matmul %1, %2, %cst {dimension_numbers = #tpu.dot_dimension_numbers<[1], [0], [0], [1], [0, 0, 1, 1], [], []>} : vector<128x128xbf16>, vector<128x256xbf16>, vector<128x256xf32> -> vector<128x256xf32>
    %4 = math.tanh %3 : vector<128x256xf32>
    %5 = arith.truncf %4 : vector<128x256xf32> to vector<128x256xbf16>
    %cst_5 = arith.constant dense<0.000000e+00> : vector<128x256xf32>
    %6 = tpu.matmul %0, %5, %cst_5 {dimension_numbers = #tpu.dot_dimension_numbers<[1], [0], [0], [1], [0, 0, 1, 1], [], []>} : vector<128x128xbf16>, vector<128x256xbf16>, vector<128x256xf32> -> vector<128x256xf32>
    %7 = vector.extract_strided_slice %6 {offsets = [0, 0], sizes = [128, 128], strides = [1, 1]} : vector<128x256xf32> to vector<128x128xf32>
    %8 = vector.extract_strided_slice %6 {offsets = [0, 128], sizes = [128, 128], strides = [1, 1]} : vector<128x256xf32> to vector<128x128xf32>
    %9 = arith.truncf %8 : vector<128x128xf32> to vector<128x128xbf16>
    %cst_6 = arith.constant dense<0.000000e+00> : vector<128x128xf32>
    %10 = tpu.matmul %0, %9, %cst_6 {dimension_numbers = #tpu.dot_dimension_numbers<[1], [0], [0], [1], [0, 0, 1, 1], [], []>} : vector<128x128xbf16>, vector<128x128xbf16>, vector<128x128xf32> -> vector<128x128xf32>
    %cst_7 = arith.constant dense<0.000000e+00> : vector<128xf32>
    %11 = vector.multi_reduction <add>, %7, %cst_7 [0] : vector<128x128xf32> to vector<128xf32>
    %12 = vector.shape_cast %11 : vector<128xf32> to vector<1x128xf32>
    %cst_8 = arith.constant 0.020833334 : f32
    %13 = vector.broadcast %cst_8 : f32 to vector<1x128xf32>
    %14 = arith.mulf %12, %13 : vector<1x128xf32>
    %cst_9 = arith.constant dense<0.000000e+00> : vector<128xf32>
    %15 = vector.multi_reduction <add>, %10, %cst_9 [0] : vector<128x128xf32> to vector<128xf32>
    %16 = vector.shape_cast %15 : vector<128xf32> to vector<1x128xf32>
    %cst_10 = arith.constant 0.020833334 : f32
    %17 = vector.broadcast %cst_10 : f32 to vector<1x128xf32>
    %18 = arith.mulf %16, %17 : vector<1x128xf32>
    %19 = tpu.concatenate %14, %18 in 0 : vector<1x128xf32>, vector<1x128xf32> -> vector<2x128xf32>
    %20 = tpu.iota {dimensions = array<i32: 1>} : vector<2x128xi32>
    %c16_i32 = arith.constant 16 : i32
    %21 = vector.broadcast %c16_i32 : i32 to vector<2x128xi32>
    %22 = arith.cmpi eq, %20, %21 : vector<2x128xi32>
    %cst_11 = arith.constant 1.000000e+00 : f32
    %23 = vector.broadcast %cst_11 : f32 to vector<2x128xf32>
    %24 = arith.select %22, %23, %19 : vector<2x128xi1>, vector<2x128xf32>
    %c0_12 = arith.constant 0 : index
    %c0_13 = arith.constant 0 : index
    %c0_14 = arith.constant 0 : index
    %25 = vector.load %arg3[%c0_12, %c0_13, %c0_14] : memref<2x8x128xf32, #tpu.memory_space<vmem>>, vector<1x8x128xf32>
    %26 = vector.shape_cast %25 : vector<1x8x128xf32> to vector<8x128xf32>
    %cst_15 = arith.constant dense<0.000000e+00> : vector<2x8xf32>
    %27 = tpu.matmul %24, %26, %cst_15 {dimension_numbers = #tpu.dot_dimension_numbers<[1], [1], [0], [0], [0, 0, 1, 0], [], []>} : vector<2x128xf32>, vector<8x128xf32>, vector<2x8xf32> -> vector<2x8xf32>
    %cst_16 = arith.constant 0.000000e+00 : f32
    %28 = vector.broadcast %cst_16 : f32 to vector<2x8xf32>
    %29 = arith.maximumf %27, %28 : vector<2x8xf32>
    %30 = tpu.iota {dimensions = array<i32: 1>} : vector<2x8xi32>
    %c4_i32 = arith.constant 4 : i32
    %31 = vector.broadcast %c4_i32 : i32 to vector<2x8xi32>
    %32 = arith.cmpi eq, %30, %31 : vector<2x8xi32>
    %cst_17 = arith.constant 1.000000e+00 : f32
    %33 = vector.broadcast %cst_17 : f32 to vector<2x8xf32>
    %34 = arith.select %32, %33, %29 : vector<2x8xi1>, vector<2x8xf32>
    %c1 = arith.constant 1 : index
    %c0_18 = arith.constant 0 : index
    %c0_19 = arith.constant 0 : index
    %35 = vector.load %arg3[%c1, %c0_18, %c0_19] : memref<2x8x128xf32, #tpu.memory_space<vmem>>, vector<1x8x128xf32>
    %36 = vector.shape_cast %35 : vector<1x8x128xf32> to vector<8x128xf32>
    %cst_20 = arith.constant dense<0.000000e+00> : vector<2x128xf32>
    %37 = tpu.matmul %34, %36, %cst_20 {dimension_numbers = #tpu.dot_dimension_numbers<[1], [0], [0], [1], [0, 0, 1, 1], [], []>} : vector<2x8xf32>, vector<8x128xf32>, vector<2x128xf32> -> vector<2x128xf32>
    %cst_21 = arith.constant dense<0xFF800000> : vector<128xf32>
    %38 = vector.multi_reduction <maximumf>, %37, %cst_21 [0] : vector<2x128xf32> to vector<128xf32>
    %cst_22 = arith.constant 0xFF800000 : f32
    %39 = vector.broadcast %cst_22 : f32 to vector<128xf32>
    %40 = arith.maximumf %39, %38 : vector<128xf32>
    %41 = vector.shape_cast %40 : vector<128xf32> to vector<1x128xf32>
    %42 = vector.broadcast %41 : vector<1x128xf32> to vector<2x128xf32>
    %43 = arith.subf %37, %42 : vector<2x128xf32>
    %44 = math.exp %43 : vector<2x128xf32>
    %cst_23 = arith.constant dense<0.000000e+00> : vector<128xf32>
    %45 = vector.multi_reduction <add>, %44, %cst_23 [0] : vector<2x128xf32> to vector<128xf32>
    %46 = vector.shape_cast %45 : vector<128xf32> to vector<1x128xf32>
    %47 = vector.broadcast %46 : vector<1x128xf32> to vector<2x128xf32>
    %48 = arith.divf %44, %47 : vector<2x128xf32>
    %49 = vector.extract_strided_slice %48 {offsets = [0, 0], sizes = [1, 128], strides = [1, 1]} : vector<2x128xf32> to vector<1x128xf32>
    %50 = vector.broadcast %49 : vector<1x128xf32> to vector<128x128xf32>
    %51 = arith.mulf %7, %50 : vector<128x128xf32>
    %52 = vector.extract_strided_slice %48 {offsets = [1, 0], sizes = [1, 128], strides = [1, 1]} : vector<2x128xf32> to vector<1x128xf32>
    %53 = vector.broadcast %52 : vector<1x128xf32> to vector<128x128xf32>
    %54 = arith.mulf %10, %53 : vector<128x128xf32>
    %55 = arith.addf %51, %54 : vector<128x128xf32>
    %56 = arith.truncf %55 : vector<128x128xf32> to vector<128x128xbf16>
    %c0_24 = arith.constant 0 : index
    %c0_25 = arith.constant 0 : index
    %57 = vector.load %arg4[%c0_24, %c0_25] : memref<128x256xbf16, #tpu.memory_space<vmem>>, vector<128x256xbf16>
    %cst_26 = arith.constant dense<0.000000e+00> : vector<128x256xf32>
    %58 = tpu.matmul %56, %57, %cst_26 {dimension_numbers = #tpu.dot_dimension_numbers<[1], [0], [0], [1], [0, 0, 1, 1], [], []>} : vector<128x128xbf16>, vector<128x256xbf16>, vector<128x256xf32> -> vector<128x256xf32>
    %59 = math.tanh %58 : vector<128x256xf32>
    %60 = arith.truncf %59 : vector<128x256xf32> to vector<128x256xbf16>
    %cst_27 = arith.constant dense<0.000000e+00> : vector<128x256xf32>
    %61 = tpu.matmul %0, %60, %cst_27 {dimension_numbers = #tpu.dot_dimension_numbers<[1], [0], [0], [1], [0, 0, 1, 1], [], []>} : vector<128x128xbf16>, vector<128x256xbf16>, vector<128x256xf32> -> vector<128x256xf32>
    %62 = vector.extract_strided_slice %61 {offsets = [0, 0], sizes = [128, 128], strides = [1, 1]} : vector<128x256xf32> to vector<128x128xf32>
    %63 = vector.extract_strided_slice %61 {offsets = [0, 128], sizes = [128, 128], strides = [1, 1]} : vector<128x256xf32> to vector<128x128xf32>
    %64 = arith.truncf %63 : vector<128x128xf32> to vector<128x128xbf16>
    %cst_28 = arith.constant dense<0.000000e+00> : vector<128x128xf32>
    %65 = tpu.matmul %0, %64, %cst_28 {dimension_numbers = #tpu.dot_dimension_numbers<[1], [0], [0], [1], [0, 0, 1, 1], [], []>} : vector<128x128xbf16>, vector<128x128xbf16>, vector<128x128xf32> -> vector<128x128xf32>
    %cst_29 = arith.constant dense<0.000000e+00> : vector<128xf32>
    %66 = vector.multi_reduction <add>, %62, %cst_29 [0] : vector<128x128xf32> to vector<128xf32>
    %67 = vector.shape_cast %66 : vector<128xf32> to vector<1x128xf32>
    %cst_30 = arith.constant 0.020833334 : f32
    %68 = vector.broadcast %cst_30 : f32 to vector<1x128xf32>
    %69 = arith.mulf %67, %68 : vector<1x128xf32>
    %cst_31 = arith.constant dense<0.000000e+00> : vector<128xf32>
    %70 = vector.multi_reduction <add>, %65, %cst_31 [0] : vector<128x128xf32> to vector<128xf32>
    %71 = vector.shape_cast %70 : vector<128xf32> to vector<1x128xf32>
    %cst_32 = arith.constant 0.020833334 : f32
    %72 = vector.broadcast %cst_32 : f32 to vector<1x128xf32>
    %73 = arith.mulf %71, %72 : vector<1x128xf32>
    %74 = tpu.concatenate %69, %73 in 0 : vector<1x128xf32>, vector<1x128xf32> -> vector<2x128xf32>
    %75 = tpu.iota {dimensions = array<i32: 1>} : vector<2x128xi32>
    %c32_i32 = arith.constant 32 : i32
    %76 = vector.broadcast %c32_i32 : i32 to vector<2x128xi32>
    %77 = arith.cmpi eq, %75, %76 : vector<2x128xi32>
    %cst_33 = arith.constant 1.000000e+00 : f32
    %78 = vector.broadcast %cst_33 : f32 to vector<2x128xf32>
    %79 = arith.select %77, %78, %74 : vector<2x128xi1>, vector<2x128xf32>
    %c0_34 = arith.constant 0 : index
    %c0_35 = arith.constant 0 : index
    %c0_36 = arith.constant 0 : index
    %80 = vector.load %arg5[%c0_34, %c0_35, %c0_36] : memref<2x16x128xf32, #tpu.memory_space<vmem>>, vector<1x16x128xf32>
    %81 = vector.shape_cast %80 : vector<1x16x128xf32> to vector<16x128xf32>
    %cst_37 = arith.constant dense<0.000000e+00> : vector<2x16xf32>
    %82 = tpu.matmul %79, %81, %cst_37 {dimension_numbers = #tpu.dot_dimension_numbers<[1], [1], [0], [0], [0, 0, 1, 0], [], []>} : vector<2x128xf32>, vector<16x128xf32>, vector<2x16xf32> -> vector<2x16xf32>
    %cst_38 = arith.constant 0.000000e+00 : f32
    %83 = vector.broadcast %cst_38 : f32 to vector<2x16xf32>
    %84 = arith.maximumf %82, %83 : vector<2x16xf32>
    %85 = tpu.iota {dimensions = array<i32: 1>} : vector<2x16xi32>
    %c8_i32 = arith.constant 8 : i32
    %86 = vector.broadcast %c8_i32 : i32 to vector<2x16xi32>
    %87 = arith.cmpi eq, %85, %86 : vector<2x16xi32>
    %cst_39 = arith.constant 1.000000e+00 : f32
    %88 = vector.broadcast %cst_39 : f32 to vector<2x16xf32>
    %89 = arith.select %87, %88, %84 : vector<2x16xi1>, vector<2x16xf32>
    %c1_40 = arith.constant 1 : index
    %c0_41 = arith.constant 0 : index
    %c0_42 = arith.constant 0 : index
    %90 = vector.load %arg5[%c1_40, %c0_41, %c0_42] : memref<2x16x128xf32, #tpu.memory_space<vmem>>, vector<1x16x128xf32>
    %91 = vector.shape_cast %90 : vector<1x16x128xf32> to vector<16x128xf32>
    %cst_43 = arith.constant dense<0.000000e+00> : vector<2x128xf32>
    %92 = tpu.matmul %89, %91, %cst_43 {dimension_numbers = #tpu.dot_dimension_numbers<[1], [0], [0], [1], [0, 0, 1, 1], [], []>} : vector<2x16xf32>, vector<16x128xf32>, vector<2x128xf32> -> vector<2x128xf32>
    %cst_44 = arith.constant dense<0xFF800000> : vector<128xf32>
    %93 = vector.multi_reduction <maximumf>, %92, %cst_44 [0] : vector<2x128xf32> to vector<128xf32>
    %cst_45 = arith.constant 0xFF800000 : f32
    %94 = vector.broadcast %cst_45 : f32 to vector<128xf32>
    %95 = arith.maximumf %94, %93 : vector<128xf32>
    %96 = vector.shape_cast %95 : vector<128xf32> to vector<1x128xf32>
    %97 = vector.broadcast %96 : vector<1x128xf32> to vector<2x128xf32>
    %98 = arith.subf %92, %97 : vector<2x128xf32>
    %99 = math.exp %98 : vector<2x128xf32>
    %cst_46 = arith.constant dense<0.000000e+00> : vector<128xf32>
    %100 = vector.multi_reduction <add>, %99, %cst_46 [0] : vector<2x128xf32> to vector<128xf32>
    %101 = vector.shape_cast %100 : vector<128xf32> to vector<1x128xf32>
    %102 = vector.broadcast %101 : vector<1x128xf32> to vector<2x128xf32>
    %103 = arith.divf %99, %102 : vector<2x128xf32>
    %104 = vector.extract_strided_slice %103 {offsets = [0, 0], sizes = [1, 128], strides = [1, 1]} : vector<2x128xf32> to vector<1x128xf32>
    %105 = vector.broadcast %104 : vector<1x128xf32> to vector<128x128xf32>
    %106 = arith.mulf %62, %105 : vector<128x128xf32>
    %107 = vector.extract_strided_slice %103 {offsets = [1, 0], sizes = [1, 128], strides = [1, 1]} : vector<2x128xf32> to vector<1x128xf32>
    %108 = vector.broadcast %107 : vector<1x128xf32> to vector<128x128xf32>
    %109 = arith.mulf %65, %108 : vector<128x128xf32>
    %110 = arith.addf %106, %109 : vector<128x128xf32>
    %111 = arith.truncf %110 : vector<128x128xf32> to vector<128x128xbf16>
    %c0_47 = arith.constant 0 : index
    %c0_48 = arith.constant 0 : index
    %112 = vector.load %arg6[%c0_47, %c0_48] : memref<128x256xbf16, #tpu.memory_space<vmem>>, vector<128x256xbf16>
    %cst_49 = arith.constant dense<0.000000e+00> : vector<128x256xf32>
    %113 = tpu.matmul %111, %112, %cst_49 {dimension_numbers = #tpu.dot_dimension_numbers<[1], [0], [0], [1], [0, 0, 1, 1], [], []>} : vector<128x128xbf16>, vector<128x256xbf16>, vector<128x256xf32> -> vector<128x256xf32>
    %114 = arith.truncf %113 : vector<128x256xf32> to vector<128x256xbf16>
    %cst_50 = arith.constant dense<0.000000e+00> : vector<128x256xf32>
    %115 = tpu.matmul %0, %114, %cst_50 {dimension_numbers = #tpu.dot_dimension_numbers<[1], [0], [0], [1], [0, 0, 1, 1], [], []>} : vector<128x128xbf16>, vector<128x256xbf16>, vector<128x256xf32> -> vector<128x256xf32>
    %116 = vector.extract_strided_slice %115 {offsets = [0, 0], sizes = [128, 128], strides = [1, 1]} : vector<128x256xf32> to vector<128x128xf32>
    %117 = vector.extract_strided_slice %115 {offsets = [0, 128], sizes = [128, 128], strides = [1, 1]} : vector<128x256xf32> to vector<128x128xf32>
    %118 = arith.truncf %117 : vector<128x128xf32> to vector<128x128xbf16>
    %cst_51 = arith.constant dense<0.000000e+00> : vector<128x128xf32>
    %119 = tpu.matmul %0, %118, %cst_51 {dimension_numbers = #tpu.dot_dimension_numbers<[1], [0], [0], [1], [0, 0, 1, 1], [], []>} : vector<128x128xbf16>, vector<128x128xbf16>, vector<128x128xf32> -> vector<128x128xf32>
    %cst_52 = arith.constant dense<0.000000e+00> : vector<128xf32>
    %120 = vector.multi_reduction <add>, %116, %cst_52 [0] : vector<128x128xf32> to vector<128xf32>
    %121 = vector.shape_cast %120 : vector<128xf32> to vector<1x128xf32>
    %cst_53 = arith.constant 0.020833334 : f32
    %122 = vector.broadcast %cst_53 : f32 to vector<1x128xf32>
    %123 = arith.mulf %121, %122 : vector<1x128xf32>
    %cst_54 = arith.constant dense<0.000000e+00> : vector<128xf32>
    %124 = vector.multi_reduction <add>, %119, %cst_54 [0] : vector<128x128xf32> to vector<128xf32>
    %125 = vector.shape_cast %124 : vector<128xf32> to vector<1x128xf32>
    %cst_55 = arith.constant 0.020833334 : f32
    %126 = vector.broadcast %cst_55 : f32 to vector<1x128xf32>
    %127 = arith.mulf %125, %126 : vector<1x128xf32>
    %128 = tpu.concatenate %123, %127 in 0 : vector<1x128xf32>, vector<1x128xf32> -> vector<2x128xf32>
    %129 = tpu.iota {dimensions = array<i32: 1>} : vector<2x128xi32>
    %c16_i32_56 = arith.constant 16 : i32
    %130 = vector.broadcast %c16_i32_56 : i32 to vector<2x128xi32>
    %131 = arith.cmpi eq, %129, %130 : vector<2x128xi32>
    %cst_57 = arith.constant 1.000000e+00 : f32
    %132 = vector.broadcast %cst_57 : f32 to vector<2x128xf32>
    %133 = arith.select %131, %132, %128 : vector<2x128xi1>, vector<2x128xf32>
    %c0_58 = arith.constant 0 : index
    %c0_59 = arith.constant 0 : index
    %c0_60 = arith.constant 0 : index
    %134 = vector.load %arg7[%c0_58, %c0_59, %c0_60] : memref<2x8x128xf32, #tpu.memory_space<vmem>>, vector<1x8x128xf32>
    %135 = vector.shape_cast %134 : vector<1x8x128xf32> to vector<8x128xf32>
    %cst_61 = arith.constant dense<0.000000e+00> : vector<2x8xf32>
    %136 = tpu.matmul %133, %135, %cst_61 {dimension_numbers = #tpu.dot_dimension_numbers<[1], [1], [0], [0], [0, 0, 1, 0], [], []>} : vector<2x128xf32>, vector<8x128xf32>, vector<2x8xf32> -> vector<2x8xf32>
    %cst_62 = arith.constant 0.000000e+00 : f32
    %137 = vector.broadcast %cst_62 : f32 to vector<2x8xf32>
    %138 = arith.maximumf %136, %137 : vector<2x8xf32>
    %139 = tpu.iota {dimensions = array<i32: 1>} : vector<2x8xi32>
    %c4_i32_63 = arith.constant 4 : i32
    %140 = vector.broadcast %c4_i32_63 : i32 to vector<2x8xi32>
    %141 = arith.cmpi eq, %139, %140 : vector<2x8xi32>
    %cst_64 = arith.constant 1.000000e+00 : f32
    %142 = vector.broadcast %cst_64 : f32 to vector<2x8xf32>
    %143 = arith.select %141, %142, %138 : vector<2x8xi1>, vector<2x8xf32>
    %c1_65 = arith.constant 1 : index
    %c0_66 = arith.constant 0 : index
    %c0_67 = arith.constant 0 : index
    %144 = vector.load %arg7[%c1_65, %c0_66, %c0_67] : memref<2x8x128xf32, #tpu.memory_space<vmem>>, vector<1x8x128xf32>
    %145 = vector.shape_cast %144 : vector<1x8x128xf32> to vector<8x128xf32>
    %cst_68 = arith.constant dense<0.000000e+00> : vector<2x128xf32>
    %146 = tpu.matmul %143, %145, %cst_68 {dimension_numbers = #tpu.dot_dimension_numbers<[1], [0], [0], [1], [0, 0, 1, 1], [], []>} : vector<2x8xf32>, vector<8x128xf32>, vector<2x128xf32> -> vector<2x128xf32>
    %cst_69 = arith.constant dense<0xFF800000> : vector<128xf32>
    %147 = vector.multi_reduction <maximumf>, %146, %cst_69 [0] : vector<2x128xf32> to vector<128xf32>
    %cst_70 = arith.constant 0xFF800000 : f32
    %148 = vector.broadcast %cst_70 : f32 to vector<128xf32>
    %149 = arith.maximumf %148, %147 : vector<128xf32>
    %150 = vector.shape_cast %149 : vector<128xf32> to vector<1x128xf32>
    %151 = vector.broadcast %150 : vector<1x128xf32> to vector<2x128xf32>
    %152 = arith.subf %146, %151 : vector<2x128xf32>
    %153 = math.exp %152 : vector<2x128xf32>
    %cst_71 = arith.constant dense<0.000000e+00> : vector<128xf32>
    %154 = vector.multi_reduction <add>, %153, %cst_71 [0] : vector<2x128xf32> to vector<128xf32>
    %155 = vector.shape_cast %154 : vector<128xf32> to vector<1x128xf32>
    %156 = vector.broadcast %155 : vector<1x128xf32> to vector<2x128xf32>
    %157 = arith.divf %153, %156 : vector<2x128xf32>
    %158 = vector.extract_strided_slice %157 {offsets = [0, 0], sizes = [1, 128], strides = [1, 1]} : vector<2x128xf32> to vector<1x128xf32>
    %159 = vector.broadcast %158 : vector<1x128xf32> to vector<128x128xf32>
    %160 = arith.mulf %116, %159 : vector<128x128xf32>
    %161 = vector.extract_strided_slice %157 {offsets = [1, 0], sizes = [1, 128], strides = [1, 1]} : vector<2x128xf32> to vector<1x128xf32>
    %162 = vector.broadcast %161 : vector<1x128xf32> to vector<128x128xf32>
    %163 = arith.mulf %119, %162 : vector<128x128xf32>
    %164 = arith.addf %160, %163 : vector<128x128xf32>
    %c0_72 = arith.constant 0 : index
    %c0_73 = arith.constant 0 : index
    %165 = vector.load %arg8[%c0_72, %c0_73] : memref<128x128xf32, #tpu.memory_space<vmem>>, vector<128x128xf32>
    tpu.vector_store %arg8[%c0_72, %c0_73], %164 {strides = array<i32>} : memref<128x128xf32, #tpu.memory_space<vmem>>, vector<128x128xf32>,
    return
  }
}

</mosaic_0001>

<bundles_post_ra>
// kernel: tpu_custom_call.1
= control target key start
LH: loop header
LB: loop body
LE: loop exit
PB: predicated region body
PF: predicated region fallthrough
CT: control target
= control target key end

     0   :  { %13 = vsyncpa [#allocation3], 0  ;;  %s3426_s0 = inlined_call_operand.hbm [shape: bf16[128,128], index: 0, kind: input, shape index: {}]   ;;  %s3427_s1 = inlined_call_operand.hbm [shape: bf16[128,128], index: 1, kind: input, shape index: {}]   ;;  %s3428_s2 = inlined_call_operand.hbm [shape: bf16[128,256], index: 2, kind: input, shape index: {}]   ;;  %s3429_s3 = inlined_call_operand.hbm [shape: f32[2,8,128], index: 3, kind: input, shape index: {}]   ;;  %s3430_s4 = inlined_call_operand.hbm [shape: bf16[128,256], index: 4, kind: input, shape index: {}]   ;;  %s3431_s5 = inlined_call_operand.hbm [shape: f32[2,16,128], index: 5, kind: input, shape index: {}]   ;;  %s3432_s6 = inlined_call_operand.hbm [shape: bf16[128,256], index: 6, kind: input, shape index: {}]   ;;  %s3433_s7 = inlined_call_operand.hbm [shape: f32[2,8,128], index: 7, kind: input, shape index: {}]   ;;  %s3434_s8 = inlined_call_operand.hbm [shape: f32[128,128], index: 8, kind: output, shape index: {}]  }
   0x1   :  { %14 = vsyncpa [#allocation6], 0 }
   0x2   :  { %15 = vsyncpa [#allocation9], 0 }
   0x3   :  { %16 = vsyncpa [#allocation12], 0 }
   0x4   :  { %17 = vsyncpa [#allocation15], 0 }
   0x5   :  { %18 = vsyncpa [#allocation4], 0  ;;  %s36_s29 = sshll.u32 %s3427_s1, 4  ;;  %s2757_s30 = smov [#allocation5]   ;;  %s37_s29 = int_to_ptr.hbm [resolvable:$true] %s36_s29 }
   0x6   :  { %s38_s9 = sshll.u32 %s2757_s30, 4  ;;  %s2758_s10 = smov 64   ;;  %s39_s9 = int_to_ptr.vmem [resolvable:$true] %s38_s9 }
   0x7   :  { %s2759_s11 = smov 4   ;;  %s62_s14 = sshll.u32 %s3429_s3, 4  ;;  %s63_s14 = int_to_ptr.hbm [resolvable:$true] %s62_s14 }
   0x8   :  { %44 = dma.hbm_to_vmem [thread:$0]  %s37_s29, 1024, %s39_s9, [#allocation6], %s2758_s10, %s2758_s10, %s2759_s11  }
   0x9   :  { %s2760_s15 = smov [#allocation8]   ;;  %s88_s19 = sshll.u32 %s3431_s5, 4  ;;  %s89_s19 = int_to_ptr.hbm [resolvable:$true] %s88_s19 }
   0xa   :  { %s64_s16 = sshll.u32 %s2760_s15, 4  ;;  %s2761_s1 = smov 128   ;;  %s65_s16 = int_to_ptr.vmem [resolvable:$true] %s64_s16 }
   0xb   :  { %s2762_s20 = smov 8   ;;  %s23_s23 = sshll.u32 %s3426_s0, 4  ;;  %s24_s23 = int_to_ptr.hbm [resolvable:$true] %s23_s23 }
   0xc   :  { %70 = dma.hbm_to_vmem [thread:$0]  %s63_s14, 256, %s65_s16, [#allocation9], %s2761_s1, %s2761_s1, %s2762_s20  }
   0xd   :  { %s2763_s3 = smov [#allocation11]   ;;  %s2764_s5 = smov [#allocation2]  }
   0xe   :  { %s90_s24 = sshll.u32 %s2763_s3, 4  ;;  %s25_s25 = sshll.u32 %s2764_s5, 4  ;;  %s91_s24 = int_to_ptr.vmem [resolvable:$true] %s90_s24  ;;  %s26_s25 = int_to_ptr.vmem [resolvable:$true] %s25_s25 }
   0xf   :  { %96 = dma.hbm_to_vmem [thread:$0]  %s89_s19, 512, %s91_s24, [#allocation12], %s2761_s1, %s2761_s1, %s2762_s20  }
  0x10   :  { %s49_s28 = sshll.u32 %s3428_s2, 4  ;;  %s75_s0 = sshll.u32 %s3430_s4, 4  ;;  %s50_s28 = int_to_ptr.hbm [resolvable:$true] %s49_s28  ;;  %s76_s0 = int_to_ptr.hbm [resolvable:$true] %s75_s0 }
  0x11   :  { %31 = dma.hbm_to_vmem [thread:$0]  %s24_s23, 1024, %s26_s25, [#allocation3], %s2758_s10, %s2758_s10, %s2759_s11  }
  0x12   :  { %s2765_s9 = smov [#allocation7]   ;;  %s2766_s13 = smov [#allocation10]  }
  0x13   :  { %s51_s12 = sshll.u32 %s2765_s9, 4  ;;  %s77_s14 = sshll.u32 %s2766_s13, 4  ;;  %s52_s12 = int_to_ptr.vmem [resolvable:$true] %s51_s12  ;;  %s78_s14 = int_to_ptr.vmem [resolvable:$true] %s77_s14 }
  0x14   :  { %57 = dma.hbm_to_vmem [thread:$0]  %s50_s28, 2048, %s52_s12, [#allocation6], %s2761_s1, %s2761_s1, %s2762_s20  }
  0x15   :  { %s101_s2 = sshll.u32 %s3432_s6, 4  ;;  %s114_s11 = sshll.u32 %s3433_s7, 4  ;;  %s102_s2 = int_to_ptr.hbm [resolvable:$true] %s101_s2  ;;  %s115_s11 = int_to_ptr.hbm [resolvable:$true] %s114_s11 }
  0x16   :  { %83 = dma.hbm_to_vmem [thread:$0]  %s76_s0, 2048, %s78_s14, [#allocation9], %s2761_s1, %s2761_s1, %s2762_s20  }
  0x17   :  { %s2767_s17 = smov [#allocation13]   ;;  %s2768_s19 = smov [#allocation14]  }
  0x18   :  { %s103_s18 = sshll.u32 %s2767_s17, 4  ;;  %s116_s6 = sshll.u32 %s2768_s19, 4  ;;  %s104_s18 = int_to_ptr.vmem [resolvable:$true] %s103_s18  ;;  %s117_s6 = int_to_ptr.vmem [resolvable:$true] %s116_s6 }
  0x19   :  { %109 = dma.hbm_to_vmem [thread:$0]  %s102_s2, 2048, %s104_s18, [#allocation12], %s2761_s1, %s2761_s1, %s2762_s20  }
  0x1a   :  { %122 = dma.hbm_to_vmem [thread:$0]  %s115_s11, 256, %s117_s6, [#allocation15], %s2761_s1, %s2761_s1, %s2762_s20  }
  0x1b   :  { %2745 = dma.done.wait [#allocation3], 1024  }
  0x1c   :  { %2746 = vsyncadd [#allocation3], 4294966272 }
  0x1d   :  { %2747 = dma.done.wait [#allocation6], 3072  }
  0x1e   :  { %2748 = vsyncadd [#allocation6], 4294964224 }
  0x1f   :  { %2749 = dma.done.wait [#allocation9], 2304  }
  0x20   :  { %2750 = vsyncadd [#allocation9], 4294964992 }
  0x21   :  { %2751 = dma.done.wait [#allocation12], 2560  }
  0x22   :  { %2752 = vsyncadd [#allocation12], 4294964736 }
  0x23   :  { %2753 = dma.done.wait [#allocation15], 256  }
  0x24   :  { %2754 = vsyncadd [#allocation15], 4294967040  ;;  %v2326_v0 = vld [vmem:[#allocation7 + $0x74] sm:$0xf]  ;;  %v2129_v1 = vld [vmem:[#allocation7 + $0x78] sm:$0xf0] }
  0x25   :  { %v2324_v2 = vld [vmem:[#allocation7 + $0x64] sm:$0xf]  ;;  %v2132_v3 = vor.u32 %v2326_v0, %v2129_v1  ;;  %v2121_v4 = vld [vmem:[#allocation7 + $0x68] sm:$0xf0]  ;;  %v2322_v6 = vld [vmem:[#allocation7 + $0x54] sm:$0xf] }
  0x26   :  { %v2124_v5 = vor.u32 %v2324_v2, %v2121_v4  ;;  %v2113_v7 = vld [vmem:[#allocation7 + $0x58] sm:$0xf0]  ;;  %v2320_v9 = vld [vmem:[#allocation7 + $0x44] sm:$0xf]  ;;  %v2105_v10 = vld [vmem:[#allocation7 + $0x48] sm:$0xf0] }
  0x27   :  { %380 = vmatpush.bf16.msra.mxu1 %v2132_v3  ;;  %2360 = vmatpush.bf16.msra.mxu2 %v2132_v3  ;;  %v2116_v8 = vor.u32 %v2322_v6, %v2113_v7  ;;  %v2108_v11 = vor.u32 %v2320_v9, %v2105_v10  ;;  %v2318_v12 = vld [vmem:[#allocation7 + $0x34] sm:$0xf]  ;;  %v2097_v13 = vld [vmem:[#allocation7 + $0x38] sm:$0xf0]  ;;  %v2316_v15 = vld [vmem:[#allocation7 + $0x24] sm:$0xf] }
  0x28   :  { %v2100_v14 = vor.u32 %v2318_v12, %v2097_v13  ;;  %v2089_v16 = vld [vmem:[#allocation7 + $0x28] sm:$0xf0]  ;;  %v2314_v18 = vld [vmem:[#allocation7 + $0x14] sm:$0xf]  ;;  %v2081_v19 = vld [vmem:[#allocation7 + $0x18] sm:$0xf0] }
  0x29   :  { %v2092_v17 = vor.u32 %v2316_v15, %v2089_v16  ;;  %v2084_v20 = vor.u32 %v2314_v18, %v2081_v19  ;;  %v2312_v21 = vld [vmem:[#allocation7 + $0x4] sm:$0xf]  ;;  %v2073_v22 = vld [vmem:[#allocation7 + $0x8] sm:$0xf0]  ;;  %v2127_v26 = vld [vmem:[#allocation7 + $0x70] sm:$0xf] }
  0x2a   :  { %v2076_v23 = vor.u32 %v2312_v21, %v2073_v22  ;;  %v2304_v24 = vld [vmem:[#allocation2] sm:$0xff]  ;;  %v2309_v25 = vld [vmem:[#allocation2 + $0x28] sm:$0xff]  ;;  %v2327_v27 = vld [vmem:[#allocation7 + $0x74] sm:$0xf0]  ;;  %vm724_vm0 = vcmask 1040384   ;;  %vm756_vm3 = vcmask 64512  }
  0x2b   :  { %381 = vmatpush.bf16.msra.mxu1 %v2124_v5  ;;  %2361 = vmatpush.bf16.msra.mxu2 %v2124_v5  ;;  %v2119_v28 = vld [vmem:[#allocation7 + $0x60] sm:$0xf]  ;;  %v2128_v29 = vor.u32 %v2327_v27, %v2127_v26  ;;  %v2325_v30 = vld [vmem:[#allocation7 + $0x64] sm:$0xf0]  ;;  %v2111_v32 = vld [vmem:[#allocation7 + $0x50] sm:$0xf] }
  0x2c   :  { %v2120_v31 = vor.u32 %v2325_v30, %v2119_v28  ;;  %v2323_v33 = vld [vmem:[#allocation7 + $0x54] sm:$0xf0]  ;;  %v2305_v35 = vld [vmem:[#allocation2 + $0x8] sm:$0xff]  ;;  %v2310_v36 = vld [vmem:[#allocation2 + $0x30] sm:$0xff]  ;;  %vm780_vm4 = vcmask 1041408   ;;  %vm1343_vm11 = vcmask 130048  }
  0x2d   :  { %331 = vmatpush.bf16.msra.mxu0 %v2128_v29  ;;  %v2112_v34 = vor.u32 %v2323_v33, %v2111_v32  ;;  %v2103_v37 = vld [vmem:[#allocation7 + $0x40] sm:$0xf]  ;;  %v2321_v38 = vld [vmem:[#allocation7 + $0x44] sm:$0xf0]  ;;  %v2095_v39 = vld [vmem:[#allocation7 + $0x30] sm:$0xf] }
  0x2e   :  { %v2104_v40 = vor.u32 %v2321_v38, %v2103_v37  ;;  %v2319_v41 = vld [vmem:[#allocation7 + $0x34] sm:$0xf0]  ;;  %v2087_v43 = vld [vmem:[#allocation7 + $0x20] sm:$0xf]  ;;  %v2317_v44 = vld [vmem:[#allocation7 + $0x24] sm:$0xf0] }
  0x2f   :  { %382 = vmatpush.bf16.msra.mxu1 %v2116_v8  ;;  %2362 = vmatpush.bf16.msra.mxu2 %v2116_v8  ;;  %v2096_v42 = vor.u32 %v2319_v41, %v2095_v39  ;;  %v2088_v45 = vor.u32 %v2317_v44, %v2087_v43  ;;  %v2079_v46 = vld [vmem:[#allocation7 + $0x10] sm:$0xf]  ;;  %v2315_v47 = vld [vmem:[#allocation7 + $0x14] sm:$0xf0]  ;;  %v2071_v51 = vld [vmem:[#allocation7] sm:$0xf] }
  0x30   :  { %v2080_v48 = vor.u32 %v2315_v47, %v2079_v46  ;;  %v2306_v49 = vld [vmem:[#allocation2 + $0x10] sm:$0xff]  ;;  %v2311_v50 = vld [vmem:[#allocation2 + $0x38] sm:$0xff]  ;;  %v2313_v52 = vld [vmem:[#allocation7 + $0x4] sm:$0xf0]  ;;  %s2769_s7 = smov [#allocation16]   ;;  %s2020_s3 = sshll.u32 %s3434_s8, 4  ;;  %s2021_s3 = int_to_ptr.hbm [resolvable:$true] %s2020_s3 }
  0x31   :  { %332 = vmatpush.bf16.msra.mxu0 %v2120_v31  ;;  %v2072_v53 = vor.u32 %v2313_v52, %v2071_v51  ;;  %v2307_v54 = vld [vmem:[#allocation2 + $0x18] sm:$0xff]  ;;  %v2308_v55 = vld [vmem:[#allocation2 + $0x20] sm:$0xff]  ;;  %v2875_v43 = vld [vmem:[#allocation5 + $0x8] sm:$0xff]  ;;  %s2018_s21 = sshll.u32 %s2769_s7, 4  ;;  %s2019_s21 = int_to_ptr.vmem [resolvable:$true] %s2018_s21 }
  0x32   :  { %v2878_v46 = vld [vmem:[#allocation5 + $0x10] sm:$0xff]  ;;  %v2884_v52 = vld [vmem:[#allocation5 + $0x20] sm:$0xff] }
  0x33   :  { %383 = vmatpush.bf16.msra.mxu1 %v2108_v11  ;;  %2363 = vmatpush.bf16.msra.mxu2 %v2108_v11 }
  0x35   :  { %333 = vmatpush.bf16.msra.mxu0 %v2112_v34 }
  0x37   :  { %384 = vmatpush.bf16.msra.mxu1 %v2100_v14  ;;  %2364 = vmatpush.bf16.msra.mxu2 %v2100_v14 }
  0x39   :  { %334 = vmatpush.bf16.msra.mxu0 %v2104_v40  ;;  %v2872_v40 = vld [vmem:[#allocation5] sm:$0xff] }
  0x3b   :  { %385 = vmatpush.bf16.msra.mxu1 %v2092_v17  ;;  %2365 = vmatpush.bf16.msra.mxu2 %v2092_v17 }
  0x3d   :  { %335 = vmatpush.bf16.msra.mxu0 %v2096_v42 }
  0x3f   :  { %386 = vmatpush.bf16.msra.mxu1 %v2084_v20  ;;  %2366 = vmatpush.bf16.msra.mxu2 %v2084_v20 }
  0x41   :  { %336 = vmatpush.bf16.msra.mxu0 %v2088_v45 }
  0x43   :  { %387 = vmatpush.bf16.msra.mxu1 %v2076_v23  ;;  %2367 = vmatpush.bf16.msra.mxu2 %v2076_v23 }
  0x45   :  { %337 = vmatpush.bf16.msra.mxu0 %v2080_v48 }
  0x46   :  { %388 = vmatmul.bf16.vlgmr.msra.gmra.mxu1 %v2304_v24  ;;  %413 = vmatmul.bf16.vlgmr.msra.gmra.mxu2 %v2309_v25 }
  0x49   :  { %338 = vmatpush.bf16.msra.mxu0 %v2072_v53 }
  0x4c   :  { %339 = vmatmul.bf16.vlgmr.msra.gmra.mxu0 %v2304_v24 }
  0x56   :  { %393 = vmatmul.bf16.gmra.mxu1 %v2305_v35  ;;  %418 = vmatmul.bf16.gmra.mxu2 %v2310_v36 }
  0x5c   :  { %344 = vmatmul.bf16.gmra.mxu0 %v2305_v35 }
  0x66   :  { %398 = vmatmul.bf16.gmra.mxu1 %v2306_v49  ;;  %423 = vmatmul.bf16.gmra.mxu2 %v2311_v50 }
  0x6c   :  { %349 = vmatmul.bf16.gmra.mxu0 %v2306_v49  ;;  %v2881_v49 = vld [vmem:[#allocation5 + $0x18] sm:$0xff] }
  0x76   :  { %403 = vmatmul.bf16.gmra.mxu1 %v2307_v54 }
  0x7c   :  { %354 = vmatmul.bf16.gmra.mxu0 %v2307_v54 }
  0x86   :  { %408 = vmatmul.bf16.gmra.mxu1 %v2308_v55 }
  0x8c   :  { %359 = vmatmul.bf16.gmra.mxu0 %v2308_v55 }
  0x9c   :  { %364 = vmatmul.bf16.gmra.mxu0 %v2309_v25 }
  0xac   :  { %369 = vmatmul.bf16.gmra.mxu0 %v2310_v36 }
  0xbc   :  { %374 = vmatmul.bf16.gmra.mxu0 %v2311_v50 }
  0xc3   :  { %v2857_v56 = vpop.f32.mrf.mxu1 }
  0xc9   :  { %v414_v57 = vpop.f32.mrf.mxu2  ;;  %v2859_v2 = vpop.f32.mrf.mxu0 }
  0xcb   :  { %v391_v58 = vpop.f32.mrf.mxu1 }
  0xd1   :  { %v416_v59 = vpop.f32.mrf.mxu2  ;;  %v2861_v5 = vpop.f32.mrf.mxu0 }
  0xd3   :  { %v394_v60 = vpop.f32.mrf.mxu1 }
  0xd9   :  { %v419_v61 = vpop.f32.mrf.mxu2  ;;  %v2863_v11 = vpop.f32.mrf.mxu0 }
  0xdb   :  { %v396_v62 = vpop.f32.mrf.mxu1 }
  0xe1   :  { %v421_v63 = vpop.f32.mrf.mxu2  ;;  %v2865_v18 = vpop.f32.mrf.mxu0 }
  0xe3   :  { %v399_v0 = vpop.f32.mrf.mxu1 }
  0xe9   :  { %v424_v1 = vpop.f32.mrf.mxu2  ;;  %v2867_v20 = vpop.f32.mrf.mxu0 }
  0xea   :  { %2381 = vtanh.f32 %v424_v1 }
  0xeb   :  { %v401_v3 = vpop.f32.mrf.mxu1 }
  0xf0   :  { %v2382_v7 = vpop.eup %2381 }
  0xf1   :  { %v426_v4 = vpop.f32.mrf.mxu2  ;;  %v2869_v23 = vpop.f32.mrf.mxu0 }
  0xf2   :  { %2383 = vtanh.f32 %v426_v4 }
  0xf3   :  { %2385 = vtanh.f32 %v419_v61  ;;  %v404_v6 = vpop.f32.mrf.mxu1 }
  0xf4   :  { %2387 = vtanh.f32 %v421_v63 }
  0xf5   :  { %2389 = vtanh.f32 %v414_v57 }
  0xf6   :  { %2391 = vtanh.f32 %v416_v59 }
  0xf8   :  { %v2384_v8 = vpop.eup %2383 }
  0xf9   :  { %v2386_v9 = vpop.eup %2385  ;;  %v476_v10 = vpack.c.bf16 %v2384_v8, %v2382_v7  ;;  %v355_v30 = vpop.f32.mrf.mxu0 }
  0xfa   :  { %v2388_v12 = vpop.eup %2387 }
  0xfb   :  { %v406_v13 = vpop.f32.mrf.mxu1  ;;  %574 = vmatpush.bf16.msra.mxu3 %v476_v10  ;;  %v2390_v14 = vpop.eup %2389  ;;  %v474_v15 = vpack.c.bf16 %v2388_v12, %v2386_v9 }
  0xfc   :  { %v2392_v16 = vpop.eup %2391 }
  0xfd   :  { %v472_v17 = vpack.c.bf16 %v2392_v16, %v2390_v14  ;;  %v2896_v16 = vld [vmem:[#allocation5 + $0x30] sm:$0xff] }
  0xff   :  { %575 = vmatpush.bf16.msra.mxu3 %v474_v15 }
 0x101   :  { %v357_v37 = vpop.f32.mrf.mxu0 }
 0x103   :  { %v409_v19 = vpop.f32.mrf.mxu1  ;;  %576 = vmatpush.bf16.msra.mxu3 %v472_v17 }
 0x104   :  { %2393 = vtanh.f32 %v409_v19 }
 0x109   :  { %v360_v41 = vpop.f32.mrf.mxu0 }
 0x10a   :  { %v2394_v22 = vpop.eup %2393 }
 0x10b   :  { %v411_v21 = vpop.f32.mrf.mxu1 }
 0x10c   :  { %2395 = vtanh.f32 %v411_v21 }
 0x10d   :  { %2397 = vtanh.f32 %v406_v13 }
 0x10e   :  { %2399 = vtanh.f32 %v404_v6 }
 0x10f   :  { %2401 = vtanh.f32 %v401_v3  ;;  %v2889_v3 = vld [vmem:[#allocation5 + $0x28] sm:$0xff] }
 0x110   :  { %2403 = vtanh.f32 %v399_v0 }
 0x111   :  { %2405 = vtanh.f32 %v396_v62  ;;  %v362_v42 = vpop.f32.mrf.mxu0 }
 0x112   :  { %v2396_v24 = vpop.eup %2395  ;;  %2407 = vtanh.f32 %v394_v60 }
 0x113   :  { %v470_v25 = vpack.c.bf16 %v2396_v24, %v2394_v22  ;;  %v2398_v26 = vpop.eup %2397  ;;  %2409 = vtanh.f32 %v391_v58 }
 0x114   :  { %v2400_v27 = vpop.eup %2399  ;;  %2411 = vtanh.f32 %v2857_v56 }
 0x115   :  { %577 = vmatpush.bf16.msra.mxu3 %v470_v25  ;;  %v468_v28 = vpack.c.bf16 %v2398_v26, %v2400_v27  ;;  %v2402_v29 = vpop.eup %2401 }
 0x116   :  { %v2404_v31 = vpop.eup %2403 }
 0x117   :  { %v466_v32 = vpack.c.bf16 %v2402_v29, %v2404_v31  ;;  %v2406_v33 = vpop.eup %2405 }
 0x118   :  { %v2408_v34 = vpop.eup %2407 }
 0x119   :  { %578 = vmatpush.bf16.msra.mxu3 %v468_v28  ;;  %v464_v35 = vpack.c.bf16 %v2406_v33, %v2408_v34  ;;  %v2410_v36 = vpop.eup %2409  ;;  %v365_v44 = vpop.f32.mrf.mxu0 }
 0x11a   :  { %v2412_v38 = vpop.eup %2411 }
 0x11b   :  { %v462_v39 = vpack.c.bf16 %v2410_v36, %v2412_v38 }
 0x11d   :  { %579 = vmatpush.bf16.msra.mxu3 %v466_v32 }
 0x121   :  { %580 = vmatpush.bf16.msra.mxu3 %v464_v35  ;;  %v367_v45 = vpop.f32.mrf.mxu0 }
 0x125   :  { %581 = vmatpush.bf16.msra.mxu3 %v462_v39 }
 0x128   :  { %582 = vmatmul.bf16.vlgmr.msra.gmra.mxu3 %v2872_v40 }
 0x129   :  { %v370_v47 = vpop.f32.mrf.mxu0 }
 0x12a   :  { %2413 = vtanh.f32 %v370_v47 }
 0x130   :  { %v2414_v53 = vpop.eup %2413 }
 0x131   :  { %v372_v48 = vpop.f32.mrf.mxu0 }
 0x138   :  { %587 = vmatmul.bf16.gmra.mxu3 %v2875_v43 }
 0x139   :  { %v375_v50 = vpop.f32.mrf.mxu0 }
 0x13a   :  { %2415 = vtanh.f32 %v375_v50 }
 0x13b   :  { %2417 = vtanh.f32 %v372_v48 }
 0x140   :  { %v2416_v54 = vpop.eup %2415 }
 0x141   :  { %v377_v51 = vpop.f32.mrf.mxu0  ;;  %v2418_v55 = vpop.eup %2417 }
 0x142   :  { %2419 = vtanh.f32 %v377_v51  ;;  %v473_v59 = vpack.c.bf16 %v2418_v55, %v2414_v53 }
 0x143   :  { %2421 = vtanh.f32 %v365_v44 }
 0x144   :  { %2423 = vtanh.f32 %v367_v45 }
 0x145   :  { %2425 = vtanh.f32 %v360_v41 }
 0x146   :  { %2427 = vtanh.f32 %v362_v42 }
 0x147   :  { %2429 = vtanh.f32 %v355_v30 }
 0x148   :  { %592 = vmatmul.bf16.gmra.mxu3 %v2878_v46  ;;  %v2420_v56 = vpop.eup %2419  ;;  %2431 = vtanh.f32 %v357_v37 }
 0x149   :  { %v475_v57 = vpack.c.bf16 %v2420_v56, %v2416_v54  ;;  %v2422_v58 = vpop.eup %2421  ;;  %2433 = vtanh.f32 %v2867_v20 }
 0x14a   :  { %v2424_v60 = vpop.eup %2423  ;;  %2435 = vtanh.f32 %v2869_v23 }
 0x14b   :  { %525 = vmatpush.bf16.msrb.mxu2 %v475_v57  ;;  %v2426_v61 = vpop.eup %2425  ;;  %v471_v62 = vpack.c.bf16 %v2424_v60, %v2422_v58  ;;  %2437 = vtanh.f32 %v2863_v11 }
 0x14c   :  { %v2428_v63 = vpop.eup %2427  ;;  %2439 = vtanh.f32 %v2865_v18 }
 0x14d   :  { %v469_v0 = vpack.c.bf16 %v2428_v63, %v2426_v61  ;;  %v2430_v1 = vpop.eup %2429  ;;  %2441 = vtanh.f32 %v2859_v2  ;;  %v2900_v2 = vld [vmem:[#allocation5 + $0x38] sm:$0xff] }
 0x14e   :  { %v2432_v4 = vpop.eup %2431  ;;  %2443 = vtanh.f32 %v2861_v5 }
 0x14f   :  { %526 = vmatpush.bf16.msrb.mxu2 %v473_v59  ;;  %v2434_v6 = vpop.eup %2433  ;;  %v467_v8 = vpack.c.bf16 %v2432_v4, %v2430_v1 }
 0x150   :  { %v2436_v7 = vpop.eup %2435 }
 0x151   :  { %v2438_v9 = vpop.eup %2437  ;;  %v465_v10 = vpack.c.bf16 %v2436_v7, %v2434_v6 }
 0x152   :  { %v2440_v12 = vpop.eup %2439 }
 0x153   :  { %527 = vmatpush.bf16.msrb.mxu2 %v471_v62  ;;  %v2442_v13 = vpop.eup %2441  ;;  %v463_v14 = vpack.c.bf16 %v2440_v12, %v2438_v9 }
 0x154   :  { %v2444_v11 = vpop.eup %2443 }
 0x155   :  { %v461_v15 = vpack.c.bf16 %v2444_v11, %v2442_v13 }
 0x157   :  { %528 = vmatpush.bf16.msrb.mxu2 %v469_v0 }
 0x158   :  { %597 = vmatmul.bf16.gmra.mxu3 %v2881_v49 }
 0x15b   :  { %529 = vmatpush.bf16.msrb.mxu2 %v467_v8 }
 0x15f   :  { %530 = vmatpush.bf16.msrb.mxu2 %v465_v10 }
 0x163   :  { %531 = vmatpush.bf16.msrb.mxu2 %v463_v14 }
 0x167   :  { %532 = vmatpush.bf16.msrb.mxu2 %v461_v15 }
 0x168   :  { %602 = vmatmul.bf16.gmra.mxu3 %v2884_v52 }
 0x16a   :  { %533 = vmatmul.bf16.vlgmr.msrb.gmra.mxu2 %v2872_v40 }
 0x178   :  { %607 = vmatmul.bf16.gmra.mxu3 %v2889_v3 }
 0x17a   :  { %538 = vmatmul.bf16.gmra.mxu2 %v2875_v43 }
 0x188   :  { %612 = vmatmul.bf16.gmra.mxu3 %v2896_v16 }
 0x18a   :  { %543 = vmatmul.bf16.gmra.mxu2 %v2878_v46 }
 0x198   :  { %617 = vmatmul.bf16.gmra.mxu3 %v2900_v2 }
 0x19a   :  { %548 = vmatmul.bf16.gmra.mxu2 %v2881_v49 }
 0x1aa   :  { %553 = vmatmul.bf16.gmra.mxu2 %v2884_v52 }
 0x1ab   :  { %v583_v5 = vpop.f32.mrf.mxu3 }
 0x1b3   :  { %v585_v17 = vpop.f32.mrf.mxu3 }
 0x1b4   :  { %v623_v39 = vpack.c.bf16 %v585_v17, %v583_v5 }
 0x1ba   :  { %558 = vmatmul.bf16.gmra.mxu2 %v2889_v3 }
 0x1bb   :  { %v588_v18 = vpop.f32.mrf.mxu3 }
 0x1c3   :  { %v590_v19 = vpop.f32.mrf.mxu3 }
 0x1c4   :  { %v624_v38 = vpack.c.bf16 %v590_v19, %v588_v18 }
 0x1ca   :  { %563 = vmatmul.bf16.gmra.mxu2 %v2896_v16 }
 0x1cb   :  { %v593_v20 = vpop.f32.mrf.mxu3 }
 0x1d3   :  { %v595_v21 = vpop.f32.mrf.mxu3 }
 0x1d4   :  { %v625_v37 = vpack.c.bf16 %v595_v21, %v593_v20 }
 0x1da   :  { %568 = vmatmul.bf16.gmra.mxu2 %v2900_v2 }
 0x1db   :  { %v598_v22 = vpop.f32.mrf.mxu3 }
 0x1e3   :  { %v600_v23 = vpop.f32.mrf.mxu3 }
 0x1e4   :  { %v626_v36 = vpack.c.bf16 %v600_v23, %v598_v22 }
 0x1eb   :  { %v603_v24 = vpop.f32.mrf.mxu3 }
 0x1ed   :  { %v2915_v41 = vpop.f32.mrf.mxu2 }
 0x1f3   :  { %v605_v25 = vpop.f32.mrf.mxu3 }
 0x1f4   :  { %v627_v35 = vpack.c.bf16 %v605_v25, %v603_v24 }
 0x1f5   :  { %v2918_v42 = vpop.f32.mrf.mxu2 }
 0x1f6   :  { %v680_v60 = vadd.f32 %v2918_v42, %v2915_v41 }
 0x1fb   :  { %v608_v26 = vpop.f32.mrf.mxu3 }
 0x1fd   :  { %v2921_v44 = vpop.f32.mrf.mxu2 }
 0x1fe   :  { %v681_v62 = vadd.f32 %v680_v60, %v2921_v44 }
 0x203   :  { %v610_v27 = vpop.f32.mrf.mxu3 }
 0x204   :  { %v628_v34 = vpack.c.bf16 %v610_v27, %v608_v26  ;;  %v730_v27 = vld [vmem:[#allocation8] sm:$0xff] }
 0x205   :  { %v2923_v45 = vpop.f32.mrf.mxu2  ;;  %746 = vmatpush.xpose.msrb.mxu1 %v730_v27 }
 0x206   :  { %v682_v0 = vadd.f32 %v681_v62, %v2923_v45 }
 0x20b   :  { %v613_v28 = vpop.f32.mrf.mxu3 }
 0x213   :  { %v615_v29 = vpop.f32.mrf.mxu3 }
 0x214   :  { %v629_v33 = vpack.c.bf16 %v615_v29, %v613_v28 }
 0x21b   :  { %v618_v30 = vpop.f32.mrf.mxu3 }
 0x223   :  { %v620_v31 = vpop.f32.mrf.mxu3 }
 0x224   :  { %v630_v32 = vpack.c.bf16 %v620_v31, %v618_v30 }
 0x226   :  { %631 = vmatpush.bf16.msrb.mxu0 %v630_v32 }
 0x22a   :  { %632 = vmatpush.bf16.msrb.mxu0 %v629_v33 }
 0x22e   :  { %633 = vmatpush.bf16.msrb.mxu0 %v628_v34 }
 0x232   :  { %634 = vmatpush.bf16.msrb.mxu0 %v627_v35 }
 0x236   :  { %635 = vmatpush.bf16.msrb.mxu0 %v626_v36  ;;  %v755_v36 = vld [vmem:[#allocation8 + $0x8] sm:$0xff] }
 0x237   :  { %775 = vmatpush.msra.mxu2 %v755_v36 }
 0x23a   :  { %636 = vmatpush.bf16.msrb.mxu0 %v625_v37 }
 0x23e   :  { %637 = vmatpush.bf16.msrb.mxu0 %v624_v38 }
 0x242   :  { %638 = vmatpush.bf16.msrb.mxu0 %v623_v39 }
 0x245   :  { %639 = vmatmul.bf16.vlgmr.msrb.gmra.mxu0 %v2872_v40  ;;  %v2926_v40 = vpop.f32.mrf.mxu2 }
 0x246   :  { %v683_v1 = vadd.f32 %v682_v0, %v2926_v40 }
 0x24d   :  { %v2930_v47 = vpop.f32.mrf.mxu2 }
 0x24e   :  { %v684_v7 = vadd.f32 %v683_v1, %v2930_v47 }
 0x255   :  { %644 = vmatmul.bf16.gmra.mxu0 %v2875_v43  ;;  %v2934_v50 = vpop.f32.mrf.mxu2 }
 0x256   :  { %v685_v8 = vadd.f32 %v684_v7, %v2934_v50 }
 0x25d   :  { %v2938_v53 = vpop.f32.mrf.mxu2 }
 0x25e   :  { %v686_v12 = vadd.f32 %v685_v8, %v2938_v53 }
 0x265   :  { %649 = vmatmul.bf16.gmra.mxu0 %v2878_v46  ;;  %v2944_v56 = vpop.f32.mrf.mxu2 }
 0x266   :  { %v687_v13 = vadd.f32 %v686_v12, %v2944_v56 }
 0x26d   :  { %v2948_v58 = vpop.f32.mrf.mxu2 }
 0x26e   :  { %v688_v11 = vadd.f32 %v687_v13, %v2948_v58 }
 0x275   :  { %654 = vmatmul.bf16.gmra.mxu0 %v2881_v49  ;;  %v2954_v61 = vpop.f32.mrf.mxu2 }
 0x276   :  { %v689_v5 = vadd.f32 %v688_v11, %v2954_v61 }
 0x27d   :  { %v2961_v4 = vpop.f32.mrf.mxu2 }
 0x27e   :  { %v690_v18 = vadd.f32 %v689_v5, %v2961_v4 }
 0x285   :  { %659 = vmatmul.bf16.gmra.mxu0 %v2884_v52  ;;  %v2969_v10 = vpop.f32.mrf.mxu2 }
 0x286   :  { %v691_v21 = vadd.f32 %v690_v18, %v2969_v10 }
 0x28d   :  { %v2976_v15 = vpop.f32.mrf.mxu2 }
 0x28e   :  { %v692_v25 = vadd.f32 %v691_v21, %v2976_v15 }
 0x295   :  { %664 = vmatmul.bf16.gmra.mxu0 %v2889_v3  ;;  %v2984_v20 = vpop.f32.mrf.mxu2 }
 0x296   :  { %v693_v29 = vadd.f32 %v692_v25, %v2984_v20 }
 0x29d   :  { %v2996_v31 = vpop.f32.mrf.mxu2 }
 0x29e   :  { %v694_v34 = vadd.f32 %v693_v29, %v2996_v31 }
 0x2a0   :  { %v695_v38 = vrot.slane %v694_v34, 4 }
 0x2a2   :  { %v696_v0 = vadd.f32 %v695_v38, %v694_v34 }
 0x2a4   :  { %v697_v8 = vrot.slane %v696_v0, 2 }
 0x2a5   :  { %669 = vmatmul.bf16.gmra.mxu0 %v2896_v16 }
 0x2a6   :  { %v698_v5 = vadd.f32 %v697_v8, %v696_v0  ;;  %v2342_v0 = vld [vmem:[#allocation10 + $0x74] sm:$0xf]  ;;  %v2226_v8 = vld [vmem:[#allocation10 + $0x78] sm:$0xf0] }
 0x2a8   :  { %v699_v21 = vrot.slane %v698_v5, 1 }
 0x2aa   :  { %v700_v27 = vadd.f32 %v699_v21, %v698_v5  ;;  %v2340_v21 = vld [vmem:[#allocation10 + $0x64] sm:$0xf] }
 0x2b5   :  { %674 = vmatmul.bf16.gmra.mxu0 %v2900_v2 }
 0x2c2   :  { %v2928_v43 = vpop.f32.mrf.mxu0 }
 0x2ca   :  { %v2932_v48 = vpop.f32.mrf.mxu0 }
 0x2cb   :  { %v702_v19 = vadd.f32 %v2932_v48, %v2928_v43 }
 0x2d2   :  { %v2936_v51 = vpop.f32.mrf.mxu0 }
 0x2d3   :  { %v703_v22 = vadd.f32 %v702_v19, %v2936_v51 }
 0x2da   :  { %v2940_v54 = vpop.f32.mrf.mxu0 }
 0x2db   :  { %v704_v24 = vadd.f32 %v703_v22, %v2940_v54 }
 0x2e2   :  { %v2942_v55 = vpop.f32.mrf.mxu0 }
 0x2e3   :  { %v705_v26 = vadd.f32 %v704_v24, %v2942_v55  ;;  %v726_v24 = vlaneseq }
 0x2ea   :  { %v2946_v57 = vpop.f32.mrf.mxu0 }
 0x2eb   :  { %v706_v28 = vadd.f32 %v705_v26, %v2946_v57 }
 0x2f2   :  { %v2950_v59 = vpop.f32.mrf.mxu0 }
 0x2f3   :  { %v707_v30 = vadd.f32 %v706_v28, %v2950_v59  ;;  %v3014_v28 = vand.u32 127, %v726_v24 }
 0x2f5   :  { %vm728_vm1 = vcmp.eq.s32.totalorder %v3014_v28, 16  ;;  %vm752_vm2 = vcmp.eq.s32.totalorder %v3014_v28, 4  ;;  %vm1313_vm9 = vcmp.eq.s32.totalorder %v3014_v28, 32  ;;  %vm1338_vm10 = vcmp.eq.s32.totalorder %v3014_v28, 8 }
 0x2fa   :  { %v2957_v63 = vpop.f32.mrf.mxu0 }
 0x2fb   :  { %v708_v33 = vadd.f32 %v707_v30, %v2957_v63  ;;  %v701_v30 = vmul.f32 0.020833334, %v700_v27 }
 0x302   :  { %v2963_v6 = vpop.f32.mrf.mxu0 }
 0x303   :  { %v709_v35 = vadd.f32 %v708_v33, %v2963_v6 }
 0x30a   :  { %v2967_v9 = vpop.f32.mrf.mxu0 }
 0x30b   :  { %v710_v37 = vadd.f32 %v709_v35, %v2967_v9 }
 0x312   :  { %v2973_v14 = vpop.f32.mrf.mxu0 }
 0x313   :  { %v711_v39 = vadd.f32 %v710_v37, %v2973_v14 }
 0x31a   :  { %v2979_v17 = vpop.f32.mrf.mxu0 }
 0x31b   :  { %v712_v62 = vadd.f32 %v711_v39, %v2979_v17  ;;  %v2224_v39 = vld [vmem:[#allocation10 + $0x70] sm:$0xf] }
 0x322   :  { %v2988_v23 = vpop.f32.mrf.mxu0 }
 0x323   :  { %v713_v1 = vadd.f32 %v712_v62, %v2988_v23  ;;  %v2343_v62 = vld [vmem:[#allocation10 + $0x74] sm:$0xf0] }
 0x32a   :  { %v2998_v32 = vpop.f32.mrf.mxu0 }
 0x32b   :  { %v714_v7 = vadd.f32 %v713_v1, %v2998_v32 }
 0x332   :  { %v3005_v60 = vpop.f32.mrf.mxu0 }
 0x333   :  { %v715_v12 = vadd.f32 %v714_v7, %v3005_v60  ;;  %v2225_v7 = vor.u32 %v2343_v62, %v2224_v39  ;;  %v2200_v39 = vld [vmem:[#allocation10 + $0x40] sm:$0xf]  ;;  %v2337_v62 = vld [vmem:[#allocation10 + $0x44] sm:$0xf0] }
 0x335   :  { %967 = vmatpush.bf16.msrb.mxu3 %v2225_v7 }
 0x33a   :  { %v3011_v13 = vpop.f32.mrf.mxu0 }
 0x33b   :  { %v716_v11 = vadd.f32 %v715_v12, %v3011_v13 }
 0x33d   :  { %v717_v18 = vrot.slane %v716_v11, 4 }
 0x33f   :  { %v718_v19 = vadd.f32 %v717_v18, %v716_v11  ;;  %v2229_v11 = vor.u32 %v2342_v0, %v2226_v8  ;;  %v2216_v18 = vld [vmem:[#allocation10 + $0x60] sm:$0xf]  ;;  %v2336_v0 = vld [vmem:[#allocation10 + $0x44] sm:$0xf]  ;;  %v2201_v8 = vor.u32 %v2337_v62, %v2200_v39  ;;  %v2178_v62 = vld [vmem:[#allocation10 + $0x18] sm:$0xf0] }
 0x341   :  { %v719_v22 = vrot.slane %v718_v19, 2  ;;  %1016 = vmatpush.bf16.msra.mxu1 %v2229_v11 }
 0x343   :  { %v720_v25 = vadd.f32 %v719_v22, %v718_v19  ;;  %v2341_v19 = vld [vmem:[#allocation10 + $0x64] sm:$0xf0] }
 0x344   :  { %v2217_v24 = vor.u32 %v2341_v19, %v2216_v18  ;;  %v2192_v18 = vld [vmem:[#allocation10 + $0x30] sm:$0xf]  ;;  %v2335_v19 = vld [vmem:[#allocation10 + $0x34] sm:$0xf0] }
 0x345   :  { %v721_v26 = vrot.slane %v720_v25, 1 }
 0x346   :  { %968 = vmatpush.bf16.msrb.mxu3 %v2217_v24  ;;  %v2193_v24 = vor.u32 %v2335_v19, %v2192_v18  ;;  %v2328_v18 = vld [vmem:[#allocation10 + $0x4] sm:$0xf]  ;;  %v2170_v19 = vld [vmem:[#allocation10 + $0x8] sm:$0xf0] }
 0x347   :  { %v722_v29 = vadd.f32 %v721_v26, %v720_v25  ;;  %v2218_v25 = vld [vmem:[#allocation10 + $0x68] sm:$0xf0] }
 0x348   :  { %v2221_v26 = vor.u32 %v2340_v21, %v2218_v25  ;;  %v2334_v21 = vld [vmem:[#allocation10 + $0x34] sm:$0xf]  ;;  %v2194_v25 = vld [vmem:[#allocation10 + $0x38] sm:$0xf0] }
 0x349   :  { %v723_v33 = vmul.f32 0.020833334, %v722_v29  ;;  %v2208_v29 = vld [vmem:[#allocation10 + $0x50] sm:$0xf] }
 0x34a   :  { %1017 = vmatpush.bf16.msra.mxu1 %v2221_v26  ;;  %v2197_v26 = vor.u32 %v2334_v21, %v2194_v25  ;;  %v2173_v21 = vor.u32 %v2328_v18, %v2170_v19 }
 0x34b   :  { %v725_v34 = vsel %vm724_vm0, %v701_v30, %v723_v33  ;;  %v2339_v30 = vld [vmem:[#allocation10 + $0x54] sm:$0xf0]  ;;  %v2338_v33 = vld [vmem:[#allocation10 + $0x54] sm:$0xf] }
 0x34c   :  { %v729_v35 = vsel %vm728_vm1, 1.0, %v725_v34 }
 0x34d   :  { %747 = vmatmul.f32.vlgmr.msrb.gmra.mxu1 %v729_v35  ;;  %v2209_v35 = vor.u32 %v2339_v30, %v2208_v29  ;;  %v2333_v29 = vld [vmem:[#allocation10 + $0x24] sm:$0xf0]  ;;  %v2332_v30 = vld [vmem:[#allocation10 + $0x24] sm:$0xf] }
 0x34f   :  { %969 = vmatpush.bf16.msrb.mxu3 %v2209_v35 }
 0x353   :  { %970 = vmatpush.bf16.msrb.mxu3 %v2201_v8  ;;  %v2168_v8 = vld [vmem:[#allocation10] sm:$0xf] }
 0x357   :  { %971 = vmatpush.bf16.msrb.mxu3 %v2193_v24 }
 0x3ca   :  { %v748_v36 = vpop.f32.mrf.mxu1 }
 0x3cb   :  { %v751_v37 = vmax.f32 %v748_v36, 0.0  ;;  %v2210_v36 = vld [vmem:[#allocation10 + $0x58] sm:$0xf0] }
 0x3cd   :  { %v753_v38 = vsel %vm752_vm2, 1.0, %v751_v37  ;;  %v2213_v37 = vor.u32 %v2338_v33, %v2210_v36  ;;  %v2331_v36 = vld [vmem:[#allocation10 + $0x14] sm:$0xf0] }
 0x3ce   :  { %2165 = vmatmul.msk.f32.vlgmr.msra.gmra.mxu2 %vm756_vm3, %v753_v38 }
 0x3cf   :  { %1018 = vmatpush.bf16.msra.mxu1 %v2213_v37  ;;  %v2330_v37 = vld [vmem:[#allocation10 + $0x14] sm:$0xf] }
 0x451   :  { %v777_v1 = vpop.f32.mrf.mxu2 }
 0x452   :  { %v781_v12 = vsel %vm780_vm4, %v777_v1, -inf }
 0x453   :  { %v782_v5 = vrot.slane %v781_v12, 4 }
 0x455   :  { %v783_v22 = vmax.f32 %v781_v12, %v782_v5  ;;  %v2202_v12 = vld [vmem:[#allocation10 + $0x48] sm:$0xf0] }
 0x456   :  { %v2205_v11 = vor.u32 %v2336_v0, %v2202_v12  ;;  %v2329_v12 = vld [vmem:[#allocation10 + $0x4] sm:$0xf0] }
 0x457   :  { %v784_v27 = vrot.slane %v783_v22, 2 }
 0x458   :  { %1019 = vmatpush.bf16.msra.mxu1 %v2205_v11 }
 0x459   :  { %v785_v34 = vmax.f32 %v783_v22, %v784_v27  ;;  %v2184_v27 = vld [vmem:[#allocation10 + $0x20] sm:$0xf] }
 0x45a   :  { %v2185_v33 = vor.u32 %v2333_v29, %v2184_v27 }
 0x45b   :  { %v786_v38 = vrot.slane %v785_v34, 1 }
 0x45c   :  { %1020 = vmatpush.bf16.msra.mxu1 %v2197_v26  ;;  %972 = vmatpush.bf16.msrb.mxu3 %v2185_v33 }
 0x45d   :  { %v787_v7 = vmax.f32 %v785_v34, %v786_v38  ;;  %v2186_v34 = vld [vmem:[#allocation10 + $0x28] sm:$0xf0] }
 0x45e   :  { %v2189_v35 = vor.u32 %v2332_v30, %v2186_v34 }
 0x45f   :  { %v788_v5 = vsub.f32 %v777_v1, %v787_v7  ;;  %v2176_v1 = vld [vmem:[#allocation10 + $0x10] sm:$0xf]  ;;  %v2181_v7 = vor.u32 %v2330_v37, %v2178_v62 }
 0x460   :  { %1021 = vmatpush.bf16.msra.mxu1 %v2189_v35  ;;  %v2177_v39 = vor.u32 %v2331_v36, %v2176_v1 }
 0x461   :  { %v789_v22 = vmul.f32 1.442695, %v788_v5  ;;  %v2169_v5 = vor.u32 %v2329_v12, %v2168_v8 }
 0x462   :  { %973 = vmatpush.bf16.msrb.mxu3 %v2177_v39 }
 0x463   :  { %2445 = vpow2.f32 %v789_v22 }
 0x464   :  { %1022 = vmatpush.bf16.msra.mxu1 %v2181_v7 }
 0x466   :  { %974 = vmatpush.bf16.msrb.mxu3 %v2169_v5 }
 0x468   :  { %1023 = vmatpush.bf16.msra.mxu1 %v2173_v21 }
 0x469   :  { %v2446_v38 = vpop.eup %2445 }
 0x46a   :  { %v791_v0 = vsel %vm780_vm4, %v2446_v38, 0.0 }
 0x46b   :  { %v792_v11 = vrot.slane %v791_v0, 4 }
 0x46d   :  { %v793_v22 = vadd.f32 %v792_v11, %v791_v0 }
 0x46f   :  { %v794_v24 = vrot.slane %v793_v22, 2 }
 0x471   :  { %v795_v25 = vadd.f32 %v794_v24, %v793_v22 }
 0x473   :  { %v796_v26 = vrot.slane %v795_v25, 1 }
 0x475   :  { %v797_v27 = vadd.f32 %v796_v26, %v795_v25 }
 0x477   :  { %2447 = vrcp.f32 %v797_v27  ;;  %v809_v34 = vand.u32 2147483648, %v797_v27  ;;  %v807_v1 = vand.u32 2147483647, %v797_v27  ;;  %vm803_vm6 = vweird.f32 %v797_v27 }
 0x479   :  { %v810_v37 = vor.u32 1.1754944e-38, %v809_v34  ;;  %vm808_vm8 = vcmp.eq.f32.partialorder %v807_v1, 8.507059e+37 }
 0x47d   :  { %v2448_v29 = vpop.eup %2447 }
 0x47e   :  { %v799_v30 = vmul.f32 %v2448_v29, %v797_v27  ;;  %vm804_vm5 = vweird.f32 %v2448_v29 }
 0x47f   :  { %vm805_vm7 = vmor %vm803_vm6, %vm804_vm5 }
 0x480   :  { %v800_v33 = vsub.f32 1.0, %v799_v30 }
 0x482   :  { %v801_v35 = vmul.f32 %v2448_v29, %v800_v33 }
 0x484   :  { %v802_v36 = vadd.f32 %v2448_v29, %v801_v35 }
 0x486   :  { %v806_v39 = vsel %vm805_vm7, %v2448_v29, %v802_v36 }
 0x487   :  { %v811_v62 = vsel %vm808_vm8, %v810_v37, %v806_v39 }
 0x488   :  { %v812_v0 = vmul.f32 %v2446_v38, %v811_v62 }
 0x48a   :  { %v813_v7 = vperm.slane %v812_v0, 0  ;;  %v830_v8 = vperm.slane %v812_v0, 1 }
 0x48c   :  { %v814_v12 = vmul.f32 %v813_v7, %v2915_v41  ;;  %v815_v11 = vmul.f32 %v813_v7, %v2918_v42  ;;  %v831_v5 = vmul.f32 %v830_v8, %v2928_v43  ;;  %v832_v18 = vmul.f32 %v830_v8, %v2932_v48 }
 0x48d   :  { %v816_v24 = vmul.f32 %v813_v7, %v2921_v44  ;;  %v822_v25 = vmul.f32 %v813_v7, %v2944_v56  ;;  %v823_v38 = vmul.f32 %v813_v7, %v2948_v58  ;;  %v817_v26 = vmul.f32 %v813_v7, %v2923_v45 }
 0x48e   :  { %v847_v19 = vadd.f32 %v831_v5, %v814_v12  ;;  %v848_v21 = vadd.f32 %v832_v18, %v815_v11  ;;  %v833_v41 = vmul.f32 %v830_v8, %v2936_v51  ;;  %v839_v42 = vmul.f32 %v830_v8, %v2963_v6 }
 0x48f   :  { %v840_v43 = vmul.f32 %v830_v8, %v2967_v9  ;;  %v824_v48 = vmul.f32 %v813_v7, %v2954_v61  ;;  %v825_v27 = vmul.f32 %v813_v7, %v2961_v4  ;;  %v841_v29 = vmul.f32 %v830_v8, %v2973_v14 }
 0x490   :  { %v863_v22 = vpack.c.bf16 %v848_v21, %v847_v19  ;;  %v842_v44 = vmul.f32 %v830_v8, %v2979_v17  ;;  %v834_v56 = vmul.f32 %v830_v8, %v2940_v54  ;;  %v855_v30 = vadd.f32 %v839_v42, %v822_v25 }
 0x491   :  { %v856_v58 = vadd.f32 %v840_v43, %v823_v38  ;;  %v826_v45 = vmul.f32 %v813_v7, %v2969_v10  ;;  %v857_v33 = vadd.f32 %v841_v29, %v824_v48  ;;  %v827_v6 = vmul.f32 %v813_v7, %v2976_v15 }
 0x492   :  { %975 = vmatmul.bf16.vlgmr.msrb.gmra.mxu3 %v863_v22  ;;  %1024 = vmatmul.bf16.vlgmr.msra.gmra.mxu1 %v863_v22  ;;  %v858_v51 = vadd.f32 %v842_v44, %v825_v27  ;;  %v843_v9 = vmul.f32 %v830_v8, %v2988_v23  ;;  %v844_v61 = vmul.f32 %v830_v8, %v2998_v32 }
 0x493   :  { %v867_v34 = vpack.c.bf16 %v856_v58, %v855_v30  ;;  %v828_v4 = vmul.f32 %v813_v7, %v2984_v20  ;;  %v829_v14 = vmul.f32 %v813_v7, %v2996_v31  ;;  %v845_v54 = vmul.f32 %v830_v8, %v3005_v60 }
 0x494   :  { %v868_v17 = vpack.c.bf16 %v858_v51, %v857_v33  ;;  %v859_v35 = vadd.f32 %v843_v9, %v826_v45  ;;  %v846_v1 = vmul.f32 %v830_v8, %v3011_v13  ;;  %v860_v10 = vadd.f32 %v844_v61, %v827_v6 }
 0x495   :  { %v861_v36 = vadd.f32 %v845_v54, %v828_v4  ;;  %v849_v15 = vadd.f32 %v833_v41, %v816_v24  ;;  %v850_v62 = vadd.f32 %v834_v56, %v817_v26  ;;  %v818_v20 = vmul.f32 %v813_v7, %v2926_v40 }
 0x496   :  { %v862_v37 = vadd.f32 %v846_v1, %v829_v14  ;;  %v869_v39 = vpack.c.bf16 %v860_v10, %v859_v35  ;;  %v819_v31 = vmul.f32 %v813_v7, %v2930_v47  ;;  %v835_v32 = vmul.f32 %v830_v8, %v2942_v55 }
 0x497   :  { %v864_v0 = vpack.c.bf16 %v850_v62, %v849_v15  ;;  %v836_v60 = vmul.f32 %v830_v8, %v2946_v57  ;;  %v820_v5 = vmul.f32 %v813_v7, %v2934_v50  ;;  %v821_v18 = vmul.f32 %v813_v7, %v2938_v53 }
 0x498   :  { %v870_v23 = vpack.c.bf16 %v862_v37, %v861_v36  ;;  %v851_v12 = vadd.f32 %v835_v32, %v818_v20  ;;  %v837_v19 = vmul.f32 %v830_v8, %v2950_v59  ;;  %v838_v21 = vmul.f32 %v830_v8, %v2957_v63 }
 0x499   :  { %v852_v13 = vadd.f32 %v836_v60, %v819_v31 }
 0x49a   :  { %v853_v40 = vadd.f32 %v837_v19, %v820_v5  ;;  %v854_v22 = vadd.f32 %v838_v21, %v821_v18 }
 0x49b   :  { %v865_v11 = vpack.c.bf16 %v852_v13, %v851_v12 }
 0x49c   :  { %v866_v47 = vpack.c.bf16 %v854_v22, %v853_v40 }
 0x4a2   :  { %980 = vmatmul.bf16.gmra.mxu3 %v864_v0  ;;  %1029 = vmatmul.bf16.gmra.mxu1 %v864_v0 }
 0x4b2   :  { %985 = vmatmul.bf16.gmra.mxu3 %v865_v11  ;;  %1034 = vmatmul.bf16.gmra.mxu1 %v865_v11 }
 0x4c2   :  { %990 = vmatmul.bf16.gmra.mxu3 %v866_v47  ;;  %1039 = vmatmul.bf16.gmra.mxu1 %v866_v47 }
 0x4d2   :  { %995 = vmatmul.bf16.gmra.mxu3 %v867_v34  ;;  %1044 = vmatmul.bf16.gmra.mxu1 %v867_v34 }
 0x4e2   :  { %1000 = vmatmul.bf16.gmra.mxu3 %v868_v17  ;;  %1049 = vmatmul.bf16.gmra.mxu1 %v868_v17 }
 0x4f2   :  { %1005 = vmatmul.bf16.gmra.mxu3 %v869_v39  ;;  %1054 = vmatmul.bf16.gmra.mxu1 %v869_v39 }
 0x502   :  { %1010 = vmatmul.bf16.gmra.mxu3 %v870_v23  ;;  %1059 = vmatmul.bf16.gmra.mxu1 %v870_v23 }
 0x50f   :  { %v3058_v50 = vpop.f32.mrf.mxu1 }
 0x515   :  { %v3060_v53 = vpop.f32.mrf.mxu3 }
 0x517   :  { %v3062_v55 = vpop.f32.mrf.mxu1 }
 0x51d   :  { %v3064_v57 = vpop.f32.mrf.mxu3 }
 0x51f   :  { %v3066_v59 = vpop.f32.mrf.mxu1 }
 0x525   :  { %v3068_v63 = vpop.f32.mrf.mxu3 }
 0x527   :  { %v3070_v7 = vpop.f32.mrf.mxu1 }
 0x52d   :  { %v3072_v8 = vpop.f32.mrf.mxu3 }
 0x52f   :  { %v3074_v24 = vpop.f32.mrf.mxu1 }
 0x535   :  { %v3076_v25 = vpop.f32.mrf.mxu3 }
 0x537   :  { %v1037_v38 = vpop.f32.mrf.mxu1 }
 0x53d   :  { %v3078_v26 = vpop.f32.mrf.mxu3 }
 0x53f   :  { %v1040_v41 = vpop.f32.mrf.mxu1 }
 0x545   :  { %v3080_v42 = vpop.f32.mrf.mxu3 }
 0x547   :  { %v1042_v43 = vpop.f32.mrf.mxu1 }
 0x54d   :  { %v993_v48 = vpop.f32.mrf.mxu3 }
 0x54f   :  { %v1045_v27 = vpop.f32.mrf.mxu1 }
 0x555   :  { %v996_v29 = vpop.f32.mrf.mxu3 }
 0x557   :  { %v1047_v44 = vpop.f32.mrf.mxu1 }
 0x55d   :  { %v998_v56 = vpop.f32.mrf.mxu3 }
 0x55f   :  { %v1050_v30 = vpop.f32.mrf.mxu1 }
 0x565   :  { %v1001_v58 = vpop.f32.mrf.mxu3 }
 0x567   :  { %v1052_v45 = vpop.f32.mrf.mxu1 }
 0x56d   :  { %v1003_v33 = vpop.f32.mrf.mxu3 }
 0x56f   :  { %v1055_v51 = vpop.f32.mrf.mxu1 }
 0x575   :  { %v1006_v6 = vpop.f32.mrf.mxu3 }
 0x577   :  { %v1057_v9 = vpop.f32.mrf.mxu1 }
 0x57d   :  { %v1008_v34 = vpop.f32.mrf.mxu3 }
 0x57f   :  { %v1060_v61 = vpop.f32.mrf.mxu1 }
 0x580   :  { %2449 = vtanh.f32 %v1060_v61 }
 0x585   :  { %v1011_v4 = vpop.f32.mrf.mxu3 }
 0x586   :  { %v2450_v17 = vpop.eup %2449 }
 0x587   :  { %v1062_v14 = vpop.f32.mrf.mxu1 }
 0x588   :  { %2451 = vtanh.f32 %v1062_v14 }
 0x589   :  { %2453 = vtanh.f32 %v1057_v9 }
 0x58a   :  { %2455 = vtanh.f32 %v1052_v45 }
 0x58b   :  { %2457 = vtanh.f32 %v1055_v51  ;;  %v3094_v51 = vld [vmem:[#allocation5] sm:$0xff] }
 0x58c   :  { %2459 = vtanh.f32 %v1011_v4 }
 0x58d   :  { %v1013_v35 = vpop.f32.mrf.mxu3 }
 0x58e   :  { %v2452_v54 = vpop.eup %2451  ;;  %2461 = vtanh.f32 %v1013_v35 }
 0x58f   :  { %2463 = vtanh.f32 %v1050_v30  ;;  %v1112_v1 = vpack.c.bf16 %v2452_v54, %v2450_v17  ;;  %v2454_v10 = vpop.eup %2453 }
 0x590   :  { %2465 = vtanh.f32 %v1008_v34  ;;  %v2456_v36 = vpop.eup %2455 }
 0x591   :  { %2467 = vtanh.f32 %v1047_v44  ;;  %1162 = vmatpush.bf16.msra.mxu0 %v1112_v1  ;;  %v2458_v37 = vpop.eup %2457 }
 0x592   :  { %2469 = vtanh.f32 %v1006_v6  ;;  %v2460_v39 = vpop.eup %2459  ;;  %v1110_v15 = vpack.c.bf16 %v2454_v10, %v2458_v37 }
 0x593   :  { %2471 = vtanh.f32 %v1045_v27 }
 0x594   :  { %v2462_v62 = vpop.eup %2461  ;;  %2473 = vtanh.f32 %v1003_v33 }
 0x595   :  { %v2464_v23 = vpop.eup %2463  ;;  %2475 = vtanh.f32 %v1042_v43  ;;  %1163 = vmatpush.bf16.msra.mxu0 %v1110_v15  ;;  %v1111_v0 = vpack.c.bf16 %v2462_v62, %v2460_v39 }
 0x596   :  { %v2466_v20 = vpop.eup %2465  ;;  %2477 = vtanh.f32 %v1001_v58  ;;  %v1108_v32 = vpack.c.bf16 %v2456_v36, %v2464_v23 }
 0x597   :  { %v2468_v31 = vpop.eup %2467  ;;  %2479 = vtanh.f32 %v1040_v41  ;;  %1113 = vmatpush.bf16.msrb.mxu2 %v1111_v0 }
 0x598   :  { %v2470_v60 = vpop.eup %2469  ;;  %2481 = vtanh.f32 %v998_v56 }
 0x599   :  { %v2472_v12 = vpop.eup %2471  ;;  %2483 = vtanh.f32 %v1037_v38  ;;  %1164 = vmatpush.bf16.msra.mxu0 %v1108_v32  ;;  %v1109_v13 = vpack.c.bf16 %v2466_v20, %v2470_v60  ;;  %v3119_v60 = vld [vmem:[#allocation5 + $0x18] sm:$0xff] }
 0x59a   :  { %v2474_v11 = vpop.eup %2473  ;;  %2485 = vtanh.f32 %v996_v29  ;;  %v1106_v18 = vpack.c.bf16 %v2468_v31, %v2472_v12  ;;  %v3122_v12 = vld [vmem:[#allocation5 + $0x20] sm:$0xff] }
 0x59b   :  { %v2476_v5 = vpop.eup %2475  ;;  %2487 = vtanh.f32 %v3074_v24  ;;  %1114 = vmatpush.bf16.msrb.mxu2 %v1109_v13  ;;  %v3125_v13 = vld [vmem:[#allocation5 + $0x28] sm:$0xff] }
 0x59c   :  { %v2478_v19 = vpop.eup %2477  ;;  %2489 = vtanh.f32 %v993_v48 }
 0x59d   :  { %v2480_v21 = vpop.eup %2479  ;;  %2491 = vtanh.f32 %v3070_v7  ;;  %1165 = vmatpush.bf16.msra.mxu0 %v1106_v18  ;;  %v1107_v40 = vpack.c.bf16 %v2474_v11, %v2478_v19 }
 0x59e   :  { %v2482_v22 = vpop.eup %2481  ;;  %2493 = vtanh.f32 %v3080_v42  ;;  %v1104_v38 = vpack.c.bf16 %v2476_v5, %v2480_v21 }
 0x59f   :  { %v2484_v47 = vpop.eup %2483  ;;  %2495 = vtanh.f32 %v3066_v59  ;;  %1115 = vmatpush.bf16.msrb.mxu2 %v1107_v40 }
 0x5a0   :  { %v2486_v41 = vpop.eup %2485  ;;  %2497 = vtanh.f32 %v3078_v26 }
 0x5a1   :  { %v2488_v24 = vpop.eup %2487  ;;  %2499 = vtanh.f32 %v3062_v55  ;;  %1166 = vmatpush.bf16.msra.mxu0 %v1104_v38  ;;  %v1105_v43 = vpack.c.bf16 %v2482_v22, %v2486_v41 }
 0x5a2   :  { %v2490_v48 = vpop.eup %2489  ;;  %2501 = vtanh.f32 %v3076_v25  ;;  %v1102_v42 = vpack.c.bf16 %v2484_v47, %v2488_v24 }
 0x5a3   :  { %v2492_v7 = vpop.eup %2491  ;;  %2503 = vtanh.f32 %v3058_v50  ;;  %1116 = vmatpush.bf16.msrb.mxu2 %v1105_v43 }
 0x5a4   :  { %v2494_v27 = vpop.eup %2493  ;;  %2505 = vtanh.f32 %v3072_v8 }
 0x5a5   :  { %v2496_v59 = vpop.eup %2495  ;;  %1167 = vmatpush.bf16.msra.mxu0 %v1102_v42  ;;  %v1103_v29 = vpack.c.bf16 %v2490_v48, %v2494_v27  ;;  %2507 = vtanh.f32 %v3068_v63 }
 0x5a6   :  { %v2498_v26 = vpop.eup %2497  ;;  %v1100_v44 = vpack.c.bf16 %v2492_v7, %v2496_v59  ;;  %2509 = vtanh.f32 %v3064_v57  ;;  %v3098_v57 = vld [vmem:[#allocation5 + $0x8] sm:$0xff] }
 0x5a7   :  { %v2500_v55 = vpop.eup %2499  ;;  %1117 = vmatpush.bf16.msrb.mxu2 %v1103_v29  ;;  %2511 = vtanh.f32 %v3060_v53  ;;  %v3103_v53 = vld [vmem:[#allocation5 + $0x10] sm:$0xff] }
 0x5a8   :  { %v2502_v56 = vpop.eup %2501 }
 0x5a9   :  { %v2504_v25 = vpop.eup %2503  ;;  %1168 = vmatpush.bf16.msra.mxu0 %v1100_v44  ;;  %v1101_v50 = vpack.c.bf16 %v2498_v26, %v2502_v56 }
 0x5aa   :  { %v2506_v30 = vpop.eup %2505  ;;  %v1098_v8 = vpack.c.bf16 %v2500_v55, %v2504_v25 }
 0x5ab   :  { %1118 = vmatpush.bf16.msrb.mxu2 %v1101_v50  ;;  %v2508_v58 = vpop.eup %2507 }
 0x5ac   :  { %v1099_v45 = vpack.c.bf16 %v2506_v30, %v2508_v58  ;;  %v2510_v33 = vpop.eup %2509  ;;  %v1316_v58 = vld [vmem:[#allocation11 + $0x8] sm:$0xff] }
 0x5ad   :  { %1169 = vmatpush.bf16.msra.mxu0 %v1098_v8  ;;  %v2512_v63 = vpop.eup %2511  ;;  %1331 = vmatpush.xpose.msrb.mxu1 %v1316_v58 }
 0x5ae   :  { %v1097_v6 = vpack.c.bf16 %v2510_v33, %v2512_v63 }
 0x5af   :  { %1119 = vmatpush.bf16.msrb.mxu2 %v1099_v45 }
 0x5b0   :  { %1170 = vmatmul.bf16.vlgmr.msra.gmra.mxu0 %v3094_v51 }
 0x5b3   :  { %1120 = vmatpush.bf16.msrb.mxu2 %v1097_v6 }
 0x5b6   :  { %1121 = vmatmul.bf16.vlgmr.msrb.gmra.mxu2 %v3094_v51 }
 0x5c0   :  { %1175 = vmatmul.bf16.gmra.mxu0 %v3098_v57 }
 0x5c6   :  { %1126 = vmatmul.bf16.gmra.mxu2 %v3098_v57 }
 0x5d0   :  { %1180 = vmatmul.bf16.gmra.mxu0 %v2878_v46 }
 0x5d6   :  { %1131 = vmatmul.bf16.gmra.mxu2 %v3103_v53 }
 0x5e0   :  { %1185 = vmatmul.bf16.gmra.mxu0 %v2881_v49 }
 0x5e6   :  { %1136 = vmatmul.bf16.gmra.mxu2 %v2881_v49 }
 0x5f0   :  { %1190 = vmatmul.bf16.gmra.mxu0 %v2884_v52 }
 0x5f6   :  { %1141 = vmatmul.bf16.gmra.mxu2 %v2884_v52 }
 0x600   :  { %1195 = vmatmul.bf16.gmra.mxu0 %v2889_v3 }
 0x606   :  { %1146 = vmatmul.bf16.gmra.mxu2 %v2889_v3 }
 0x610   :  { %1200 = vmatmul.bf16.gmra.mxu0 %v2896_v16 }
 0x616   :  { %1151 = vmatmul.bf16.gmra.mxu2 %v2896_v16 }
 0x620   :  { %1205 = vmatmul.bf16.gmra.mxu0 %v2900_v2 }
 0x626   :  { %1156 = vmatmul.bf16.gmra.mxu2 %v2900_v2 }
 0x62d   :  { %v1171_v46 = vpop.f32.mrf.mxu0 }
 0x635   :  { %v1173_v9 = vpop.f32.mrf.mxu0 }
 0x636   :  { %v1211_v32 = vpack.c.bf16 %v1173_v9, %v1171_v46 }
 0x639   :  { %v3128_v11 = vpop.f32.mrf.mxu2 }
 0x63d   :  { %v1176_v34 = vpop.f32.mrf.mxu0 }
 0x641   :  { %v3130_v5 = vpop.f32.mrf.mxu2 }
 0x642   :  { %v1268_v27 = vadd.f32 %v3130_v5, %v3128_v11 }
 0x645   :  { %v1178_v49 = vpop.f32.mrf.mxu0 }
 0x646   :  { %v1212_v31 = vpack.c.bf16 %v1178_v49, %v1176_v34 }
 0x649   :  { %v3133_v18 = vpop.f32.mrf.mxu2 }
 0x64a   :  { %v1269_v29 = vadd.f32 %v1268_v27, %v3133_v18 }
 0x64d   :  { %v1181_v61 = vpop.f32.mrf.mxu0 }
 0x651   :  { %v3136_v19 = vpop.f32.mrf.mxu2 }
 0x652   :  { %v1270_v55 = vadd.f32 %v1269_v29, %v3136_v19 }
 0x655   :  { %v1183_v4 = vpop.f32.mrf.mxu0 }
 0x656   :  { %v1213_v20 = vpack.c.bf16 %v1183_v4, %v1181_v61 }
 0x659   :  { %v3138_v21 = vpop.f32.mrf.mxu2 }
 0x65a   :  { %v1271_v44 = vadd.f32 %v1270_v55, %v3138_v21 }
 0x65d   :  { %v1186_v14 = vpop.f32.mrf.mxu0 }
 0x661   :  { %v3142_v22 = vpop.f32.mrf.mxu2 }
 0x662   :  { %v1272_v50 = vadd.f32 %v1271_v44, %v3142_v22 }
 0x665   :  { %v1188_v52 = vpop.f32.mrf.mxu0 }
 0x666   :  { %v1214_v0 = vpack.c.bf16 %v1188_v52, %v1186_v14 }
 0x669   :  { %v3146_v38 = vpop.f32.mrf.mxu2 }
 0x66a   :  { %v1273_v30 = vadd.f32 %v1272_v50, %v3146_v38 }
 0x66d   :  { %v1191_v17 = vpop.f32.mrf.mxu0 }
 0x671   :  { %v3150_v24 = vpop.f32.mrf.mxu2 }
 0x672   :  { %v1274_v33 = vadd.f32 %v1273_v30, %v3150_v24 }
 0x675   :  { %v1193_v35 = vpop.f32.mrf.mxu0 }
 0x676   :  { %v1215_v23 = vpack.c.bf16 %v1193_v35, %v1191_v17 }
 0x67d   :  { %v1196_v54 = vpop.f32.mrf.mxu0 }
 0x685   :  { %v1198_v3 = vpop.f32.mrf.mxu0 }
 0x686   :  { %v1216_v62 = vpack.c.bf16 %v1198_v3, %v1196_v54 }
 0x68d   :  { %v1201_v1 = vpop.f32.mrf.mxu0 }
 0x695   :  { %v1203_v10 = vpop.f32.mrf.mxu0 }
 0x696   :  { %v1217_v15 = vpack.c.bf16 %v1203_v10, %v1201_v1 }
 0x69d   :  { %v1206_v36 = vpop.f32.mrf.mxu0 }
 0x6a5   :  { %v1208_v37 = vpop.f32.mrf.mxu0 }
 0x6a6   :  { %v1218_v39 = vpack.c.bf16 %v1208_v37, %v1206_v36 }
 0x6a8   :  { %1219 = vmatpush.bf16.msra.mxu3 %v1218_v39  ;;  %v1315_v39 = vld [vmem:[#allocation11] sm:$0xff] }
 0x6a9   :  { %1332 = vmatpush.xpose.msrb.mxu1 %v1315_v39 }
 0x6ac   :  { %1220 = vmatpush.bf16.msra.mxu3 %v1217_v15 }
 0x6b0   :  { %1221 = vmatpush.bf16.msra.mxu3 %v1216_v62 }
 0x6b4   :  { %1222 = vmatpush.bf16.msra.mxu3 %v1215_v23 }
 0x6b8   :  { %1223 = vmatpush.bf16.msra.mxu3 %v1214_v0 }
 0x6bc   :  { %1224 = vmatpush.bf16.msra.mxu3 %v1213_v20 }
 0x6c0   :  { %1225 = vmatpush.bf16.msra.mxu3 %v1212_v31  ;;  %v1342_v31 = vld [vmem:[#allocation11 + $0x18] sm:$0xff] }
 0x6c1   :  { %1361 = vmatpush.msra.mxu2 %v1342_v31 }
 0x6c4   :  { %1226 = vmatpush.bf16.msra.mxu3 %v1211_v32 }
 0x6c7   :  { %1227 = vmatmul.bf16.vlgmr.msra.gmra.mxu3 %v3094_v51 }
 0x6d7   :  { %1232 = vmatmul.bf16.gmra.mxu3 %v3098_v57 }
 0x6e7   :  { %1237 = vmatmul.bf16.gmra.mxu3 %v3103_v53 }
 0x6f7   :  { %1242 = vmatmul.bf16.gmra.mxu3 %v3119_v60 }
 0x707   :  { %1247 = vmatmul.bf16.gmra.mxu3 %v3122_v12 }
 0x717   :  { %1252 = vmatmul.bf16.gmra.mxu3 %v3125_v13 }
 0x727   :  { %1257 = vmatmul.bf16.gmra.mxu3 %v2896_v16 }
 0x737   :  { %1262 = vmatmul.bf16.gmra.mxu3 %v2900_v2  ;;  %v3156_v2 = vpop.f32.mrf.mxu2 }
 0x738   :  { %v1275_v63 = vadd.f32 %v1274_v33, %v3156_v2 }
 0x73f   :  { %v3160_v7 = vpop.f32.mrf.mxu2 }
 0x740   :  { %v1276_v46 = vadd.f32 %v1275_v63, %v3160_v7 }
 0x747   :  { %v3166_v59 = vpop.f32.mrf.mxu2 }
 0x748   :  { %v1277_v34 = vadd.f32 %v1276_v46, %v3166_v59 }
 0x74a   :  { %v3140_v40 = vpop.f32.mrf.mxu3 }
 0x74f   :  { %v3173_v56 = vpop.f32.mrf.mxu2 }
 0x750   :  { %v1278_v61 = vadd.f32 %v1277_v34, %v3173_v56 }
 0x752   :  { %v3144_v47 = vpop.f32.mrf.mxu3 }
 0x753   :  { %v1290_v4 = vadd.f32 %v3144_v47, %v3140_v40 }
 0x757   :  { %v3181_v45 = vpop.f32.mrf.mxu2 }
 0x758   :  { %v1279_v52 = vadd.f32 %v1278_v61, %v3181_v45 }
 0x75a   :  { %v3148_v41 = vpop.f32.mrf.mxu3 }
 0x75b   :  { %v1291_v17 = vadd.f32 %v1290_v4, %v3148_v41 }
 0x75f   :  { %v3188_v9 = vpop.f32.mrf.mxu2 }
 0x760   :  { %v1280_v3 = vadd.f32 %v1279_v52, %v3188_v9 }
 0x762   :  { %v3152_v16 = vpop.f32.mrf.mxu3 }
 0x763   :  { %v1292_v54 = vadd.f32 %v1291_v17, %v3152_v16 }
 0x767   :  { %v3196_v14 = vpop.f32.mrf.mxu2 }
 0x768   :  { %v1281_v36 = vadd.f32 %v1280_v3, %v3196_v14 }
 0x76a   :  { %v3154_v43 = vpop.f32.mrf.mxu3 }
 0x76b   :  { %v1293_v1 = vadd.f32 %v1292_v54, %v3154_v43 }
 0x76f   :  { %v3208_v15 = vpop.f32.mrf.mxu2 }
 0x770   :  { %v1282_v0 = vadd.f32 %v1281_v36, %v3208_v15 }
 0x772   :  { %v3158_v48 = vpop.f32.mrf.mxu3  ;;  %v1283_v27 = vrot.slane %v1282_v0, 4 }
 0x773   :  { %v1294_v10 = vadd.f32 %v1293_v1, %v3158_v48 }
 0x774   :  { %v1284_v50 = vadd.f32 %v1283_v27, %v1282_v0 }
 0x776   :  { %v1285_v33 = vrot.slane %v1284_v50, 2 }
 0x778   :  { %v1286_v61 = vadd.f32 %v1285_v33, %v1284_v50 }
 0x77a   :  { %v3162_v42 = vpop.f32.mrf.mxu3  ;;  %v1287_v17 = vrot.slane %v1286_v61, 1 }
 0x77b   :  { %v1295_v37 = vadd.f32 %v1294_v10, %v3162_v42 }
 0x77c   :  { %v1288_v1 = vadd.f32 %v1287_v17, %v1286_v61  ;;  %v2359_v61 = vld [vmem:[#allocation13 + $0x74] sm:$0xf0] }
 0x782   :  { %v3169_v26 = vpop.f32.mrf.mxu3 }
 0x783   :  { %v1296_v23 = vadd.f32 %v1295_v37, %v3169_v26  ;;  %v1289_v37 = vmul.f32 0.020833334, %v1288_v1 }
 0x78a   :  { %v3175_v25 = vpop.f32.mrf.mxu3 }
 0x78b   :  { %v1297_v20 = vadd.f32 %v1296_v23, %v3175_v25 }
 0x792   :  { %v3179_v8 = vpop.f32.mrf.mxu3 }
 0x793   :  { %v1298_v32 = vadd.f32 %v1297_v20, %v3179_v8  ;;  %v1341_v20 = vld [vmem:[#allocation11 + $0x10] sm:$0xff] }
 0x794   :  { %1362 = vmatpush.msra.mxu2 %v1341_v20 }
 0x79a   :  { %v3185_v6 = vpop.f32.mrf.mxu3 }
 0x79b   :  { %v1299_v29 = vadd.f32 %v1298_v32, %v3185_v6 }
 0x7a2   :  { %v3191_v49 = vpop.f32.mrf.mxu3 }
 0x7a3   :  { %v1300_v44 = vadd.f32 %v1299_v29, %v3191_v49 }
 0x7aa   :  { %v3200_v35 = vpop.f32.mrf.mxu3 }
 0x7ab   :  { %v1301_v30 = vadd.f32 %v1300_v44, %v3200_v35 }
 0x7b2   :  { %v3210_v62 = vpop.f32.mrf.mxu3 }
 0x7b3   :  { %v1302_v58 = vadd.f32 %v1301_v30, %v3210_v62 }
 0x7ba   :  { %v3217_v55 = vpop.f32.mrf.mxu3 }
 0x7bb   :  { %v1303_v63 = vadd.f32 %v1302_v58, %v3217_v55 }
 0x7c2   :  { %v3223_v46 = vpop.f32.mrf.mxu3 }
 0x7c3   :  { %v1304_v34 = vadd.f32 %v1303_v63, %v3223_v46 }
 0x7c5   :  { %v1305_v4 = vrot.slane %v1304_v34, 4 }
 0x7c7   :  { %v1306_v52 = vadd.f32 %v1305_v4, %v1304_v34  ;;  %v2289_v34 = vld [vmem:[#allocation13 + $0x70] sm:$0xf]  ;;  %v2358_v4 = vld [vmem:[#allocation13 + $0x74] sm:$0xf] }
 0x7c8   :  { %v2290_v17 = vor.u32 %v2359_v61, %v2289_v34  ;;  %v2267_v61 = vld [vmem:[#allocation13 + $0x48] sm:$0xf0] }
 0x7c9   :  { %v1307_v54 = vrot.slane %v1306_v52, 2 }
 0x7ca   :  { %1553 = vmatpush.bf16.msra.mxu1 %v2290_v17  ;;  %v2257_v17 = vld [vmem:[#allocation13 + $0x30] sm:$0xf] }
 0x7cb   :  { %v1308_v3 = vadd.f32 %v1307_v54, %v1306_v52  ;;  %v2291_v54 = vld [vmem:[#allocation13 + $0x78] sm:$0xf0] }
 0x7cd   :  { %v1309_v10 = vrot.slane %v1308_v3, 1 }
 0x7cf   :  { %v1310_v36 = vadd.f32 %v1309_v10, %v1308_v3  ;;  %v2294_v3 = vor.u32 %v2358_v4, %v2291_v54  ;;  %v2281_v10 = vld [vmem:[#allocation13 + $0x60] sm:$0xf]  ;;  %v2351_v54 = vld [vmem:[#allocation13 + $0x34] sm:$0xf0] }
 0x7d1   :  { %v1311_v39 = vmul.f32 0.020833334, %v1310_v36  ;;  %1602 = vmatpush.bf16.msrb.mxu2 %v2294_v3  ;;  %v2357_v36 = vld [vmem:[#allocation13 + $0x64] sm:$0xf0] }
 0x7d3   :  { %v1312_v23 = vsel %vm724_vm0, %v1289_v37, %v1311_v39  ;;  %v2356_v37 = vld [vmem:[#allocation13 + $0x64] sm:$0xf] }
 0x7d4   :  { %v1314_v0 = vsel %vm1313_vm9, 1.0, %v1312_v23  ;;  %v2282_v23 = vor.u32 %v2357_v36, %v2281_v10  ;;  %v2350_v10 = vld [vmem:[#allocation13 + $0x34] sm:$0xf]  ;;  %v2259_v36 = vld [vmem:[#allocation13 + $0x38] sm:$0xf0] }
 0x7d5   :  { %1333 = vmatmul.f32.vlgmr.msrb.gmra.mxu1 %v1314_v0  ;;  %v2283_v0 = vld [vmem:[#allocation13 + $0x68] sm:$0xf0] }
 0x7d6   :  { %v2286_v20 = vor.u32 %v2356_v37, %v2283_v0  ;;  %1554 = vmatpush.bf16.msra.mxu1 %v2282_v23  ;;  %v2262_v37 = vor.u32 %v2350_v10, %v2259_v36  ;;  %v2349_v23 = vld [vmem:[#allocation13 + $0x24] sm:$0xf0]  ;;  %v2235_v10 = vld [vmem:[#allocation13 + $0x8] sm:$0xf0] }
 0x7d8   :  { %1603 = vmatpush.bf16.msrb.mxu2 %v2286_v20  ;;  %v2348_v20 = vld [vmem:[#allocation13 + $0x24] sm:$0xf] }
 0x852   :  { %v1334_v31 = vpop.f32.mrf.mxu1 }
 0x853   :  { %v1337_v32 = vmax.f32 %v1334_v31, 0.0  ;;  %v2273_v31 = vld [vmem:[#allocation13 + $0x50] sm:$0xf] }
 0x855   :  { %v1339_v27 = vsel %vm1338_vm10, 1.0, %v1337_v32  ;;  %v2355_v32 = vld [vmem:[#allocation13 + $0x54] sm:$0xf0] }
 0x856   :  { %2230 = vmatmul.msk.f32.vlgmr.msra.gmra.mxu2 %vm1343_vm11, %v1339_v27  ;;  %v2354_v27 = vld [vmem:[#allocation13 + $0x54] sm:$0xf] }
 0x8d9   :  { %v1364_v29 = vpop.f32.mrf.mxu2 }
 0x8da   :  { %v1367_v44 = vsel %vm780_vm4, %v1364_v29, -inf }
 0x8db   :  { %v1368_v50 = vrot.slane %v1367_v44, 4 }
 0x8dd   :  { %v1369_v30 = vmax.f32 %v1367_v44, %v1368_v50  ;;  %v2274_v44 = vor.u32 %v2355_v32, %v2273_v31  ;;  %v2275_v50 = vld [vmem:[#allocation13 + $0x58] sm:$0xf0]  ;;  %v2251_v31 = vld [vmem:[#allocation13 + $0x28] sm:$0xf0] }
 0x8df   :  { %v1370_v58 = vrot.slane %v1369_v30, 2  ;;  %1555 = vmatpush.bf16.msra.mxu1 %v2274_v44  ;;  %v2254_v44 = vor.u32 %v2348_v20, %v2251_v31 }
 0x8e1   :  { %v1371_v33 = vmax.f32 %v1369_v30, %v1370_v58  ;;  %v2278_v30 = vor.u32 %v2354_v27, %v2275_v50  ;;  %v2353_v58 = vld [vmem:[#allocation13 + $0x44] sm:$0xf0]  ;;  %v2241_v50 = vld [vmem:[#allocation13 + $0x10] sm:$0xf] }
 0x8e3   :  { %v1372_v63 = vrot.slane %v1371_v33, 1  ;;  %1604 = vmatpush.bf16.msrb.mxu2 %v2278_v30  ;;  %v2347_v30 = vld [vmem:[#allocation13 + $0x14] sm:$0xf0] }
 0x8e5   :  { %v1373_v52 = vmax.f32 %v1371_v33, %v1372_v63  ;;  %v2352_v33 = vld [vmem:[#allocation13 + $0x44] sm:$0xf] }
 0x8e7   :  { %v1374_v1 = vsub.f32 %v1364_v29, %v1373_v52  ;;  %v2265_v29 = vld [vmem:[#allocation13 + $0x40] sm:$0xf]  ;;  %v2270_v52 = vor.u32 %v2352_v33, %v2267_v61  ;;  %v2243_v33 = vld [vmem:[#allocation13 + $0x18] sm:$0xf0]  ;;  %v2242_v61 = vor.u32 %v2347_v30, %v2241_v50 }
 0x8e8   :  { %v2266_v34 = vor.u32 %v2353_v58, %v2265_v29  ;;  %v2346_v58 = vld [vmem:[#allocation13 + $0x14] sm:$0xf] }
 0x8e9   :  { %v1375_v39 = vmul.f32 1.442695, %v1374_v1  ;;  %v2258_v1 = vor.u32 %v2351_v54, %v2257_v17  ;;  %1605 = vmatpush.bf16.msrb.mxu2 %v2270_v52  ;;  %v2246_v52 = vor.u32 %v2346_v58, %v2243_v33  ;;  %v2233_v17 = vld [vmem:[#allocation13] sm:$0xf]  ;;  %v2345_v54 = vld [vmem:[#allocation13 + $0x4] sm:$0xf0] }
 0x8ea   :  { %1556 = vmatpush.bf16.msra.mxu1 %v2266_v34 }
 0x8eb   :  { %2513 = vpow2.f32 %v1375_v39  ;;  %v2249_v39 = vld [vmem:[#allocation13 + $0x20] sm:$0xf] }
 0x8ec   :  { %v2250_v27 = vor.u32 %v2349_v23, %v2249_v39 }
 0x8ed   :  { %1606 = vmatpush.bf16.msrb.mxu2 %v2262_v37 }
 0x8ee   :  { %1557 = vmatpush.bf16.msra.mxu1 %v2258_v1  ;;  %v2234_v1 = vor.u32 %v2345_v54, %v2233_v17 }
 0x8f1   :  { %v2514_v63 = vpop.eup %2513  ;;  %1607 = vmatpush.bf16.msrb.mxu2 %v2254_v44 }
 0x8f2   :  { %v1377_v4 = vsel %vm780_vm4, %v2514_v63, 0.0  ;;  %1558 = vmatpush.bf16.msra.mxu1 %v2250_v27 }
 0x8f3   :  { %v1378_v3 = vrot.slane %v1377_v4, 4 }
 0x8f5   :  { %v1379_v0 = vadd.f32 %v1378_v3, %v1377_v4  ;;  %v2344_v3 = vld [vmem:[#allocation13 + $0x4] sm:$0xf]  ;;  %1608 = vmatpush.bf16.msrb.mxu2 %v2246_v52 }
 0x8f6   :  { %1559 = vmatpush.bf16.msra.mxu1 %v2242_v61  ;;  %v2238_v36 = vor.u32 %v2344_v3, %v2235_v10 }
 0x8f7   :  { %v1380_v32 = vrot.slane %v1379_v0, 2 }
 0x8f9   :  { %v1381_v29 = vadd.f32 %v1380_v32, %v1379_v0  ;;  %1609 = vmatpush.bf16.msrb.mxu2 %v2238_v36 }
 0x8fa   :  { %1560 = vmatpush.bf16.msra.mxu1 %v2234_v1 }
 0x8fb   :  { %v1382_v34 = vrot.slane %v1381_v29, 1 }
 0x8fd   :  { %v1383_v4 = vadd.f32 %v1382_v34, %v1381_v29 }
 0x8ff   :  { %2515 = vrcp.f32 %v1383_v4  ;;  %v1395_v0 = vand.u32 2147483648, %v1383_v4  ;;  %v1393_v31 = vand.u32 2147483647, %v1383_v4  ;;  %vm1389_vm13 = vweird.f32 %v1383_v4 }
 0x901   :  { %v1396_v27 = vor.u32 1.1754944e-38, %v1395_v0  ;;  %vm1394_vm15 = vcmp.eq.f32.partialorder %v1393_v31, 8.507059e+37 }
 0x905   :  { %v2516_v37 = vpop.eup %2515 }
 0x906   :  { %v1385_v39 = vmul.f32 %v2516_v37, %v1383_v4  ;;  %vm1390_vm12 = vweird.f32 %v2516_v37 }
 0x907   :  { %vm1391_vm14 = vmor %vm1389_vm13, %vm1390_vm12 }
 0x908   :  { %v1386_v23 = vsub.f32 1.0, %v1385_v39 }
 0x90a   :  { %v1387_v20 = vmul.f32 %v2516_v37, %v1386_v23 }
 0x90c   :  { %v1388_v32 = vadd.f32 %v2516_v37, %v1387_v20 }
 0x90e   :  { %v1392_v44 = vsel %vm1391_vm14, %v2516_v37, %v1388_v32 }
 0x90f   :  { %v1397_v50 = vsel %vm1394_vm15, %v1396_v27, %v1392_v44 }
 0x910   :  { %v1398_v30 = vmul.f32 %v2514_v63, %v1397_v50 }
 0x912   :  { %v1399_v29 = vperm.slane %v1398_v30, 0  ;;  %v1416_v58 = vperm.slane %v1398_v30, 1 }
 0x914   :  { %v1400_v33 = vmul.f32 %v1399_v29, %v3128_v11  ;;  %v1401_v34 = vmul.f32 %v1399_v29, %v3130_v5  ;;  %v1417_v61 = vmul.f32 %v1416_v58, %v3140_v40  ;;  %v1418_v52 = vmul.f32 %v1416_v58, %v3144_v47 }
 0x915   :  { %v1402_v4 = vmul.f32 %v1399_v29, %v3133_v18  ;;  %v1408_v10 = vmul.f32 %v1399_v29, %v3156_v2  ;;  %v1409_v63 = vmul.f32 %v1399_v29, %v3160_v7  ;;  %v1403_v1 = vmul.f32 %v1399_v29, %v3136_v19 }
 0x916   :  { %v1433_v17 = vadd.f32 %v1417_v61, %v1400_v33  ;;  %v1434_v54 = vadd.f32 %v1418_v52, %v1401_v34  ;;  %v1419_v11 = vmul.f32 %v1416_v58, %v3148_v41  ;;  %v1425_v5 = vmul.f32 %v1416_v58, %v3175_v25 }
 0x917   :  { %v1426_v40 = vmul.f32 %v1416_v58, %v3179_v8  ;;  %v1410_v47 = vmul.f32 %v1399_v29, %v3166_v59  ;;  %v1411_v36 = vmul.f32 %v1399_v29, %v3173_v56  ;;  %v1427_v37 = vmul.f32 %v1416_v58, %v3185_v6 }
 0x918   :  { %v1449_v3 = vpack.c.bf16 %v1434_v54, %v1433_v17  ;;  %v1428_v18 = vmul.f32 %v1416_v58, %v3191_v49  ;;  %v1420_v2 = vmul.f32 %v1416_v58, %v3152_v16  ;;  %v1441_v39 = vadd.f32 %v1425_v5, %v1408_v10 }
 0x919   :  { %v1442_v7 = vadd.f32 %v1426_v40, %v1409_v63  ;;  %v1412_v19 = vmul.f32 %v1399_v29, %v3181_v45  ;;  %v1443_v23 = vadd.f32 %v1427_v37, %v1410_v47  ;;  %v1413_v25 = vmul.f32 %v1399_v29, %v3188_v9 }
 0x91a   :  { %1561 = vmatmul.bf16.vlgmr.msra.gmra.mxu1 %v1449_v3  ;;  %1610 = vmatmul.bf16.vlgmr.msrb.gmra.mxu2 %v1449_v3  ;;  %v1444_v41 = vadd.f32 %v1428_v18, %v1411_v36  ;;  %v1429_v8 = vmul.f32 %v1416_v58, %v3200_v35  ;;  %v1430_v59 = vmul.f32 %v1416_v58, %v3210_v62 }
 0x91b   :  { %v1453_v0 = vpack.c.bf16 %v1442_v7, %v1441_v39  ;;  %v1414_v56 = vmul.f32 %v1399_v29, %v3196_v14  ;;  %v1415_v6 = vmul.f32 %v1399_v29, %v3208_v15  ;;  %v1431_v16 = vmul.f32 %v1416_v58, %v3217_v55 }
 0x91c   :  { %v1454_v49 = vpack.c.bf16 %v1444_v41, %v1443_v23  ;;  %v1445_v20 = vadd.f32 %v1429_v8, %v1412_v19  ;;  %v1432_v31 = vmul.f32 %v1416_v58, %v3223_v46  ;;  %v1446_v45 = vadd.f32 %v1430_v59, %v1413_v25 }
 0x91d   :  { %v1447_v32 = vadd.f32 %v1431_v16, %v1414_v56  ;;  %v1435_v9 = vadd.f32 %v1419_v11, %v1402_v4  ;;  %v1436_v50 = vadd.f32 %v1420_v2, %v1403_v1  ;;  %v1404_v14 = vmul.f32 %v1399_v29, %v3138_v21 }
 0x91e   :  { %v1448_v27 = vadd.f32 %v1432_v31, %v1415_v6  ;;  %v1455_v44 = vpack.c.bf16 %v1446_v45, %v1445_v20  ;;  %v1405_v15 = vmul.f32 %v1399_v29, %v3142_v22  ;;  %v1421_v62 = vmul.f32 %v1416_v58, %v3154_v43 }
 0x91f   :  { %v1450_v30 = vpack.c.bf16 %v1436_v50, %v1435_v9  ;;  %v1422_v55 = vmul.f32 %v1416_v58, %v3158_v48  ;;  %v1406_v61 = vmul.f32 %v1399_v29, %v3146_v38  ;;  %v1407_v52 = vmul.f32 %v1399_v29, %v3150_v24 }
 0x920   :  { %v1456_v35 = vpack.c.bf16 %v1448_v27, %v1447_v32  ;;  %v1437_v33 = vadd.f32 %v1421_v62, %v1404_v14  ;;  %v1423_v17 = vmul.f32 %v1416_v58, %v3162_v42  ;;  %v1424_v54 = vmul.f32 %v1416_v58, %v3169_v26 }
 0x921   :  { %v1438_v46 = vadd.f32 %v1422_v55, %v1405_v15 }
 0x922   :  { %v1439_v21 = vadd.f32 %v1423_v17, %v1406_v61  ;;  %v1440_v3 = vadd.f32 %v1424_v54, %v1407_v52 }
 0x923   :  { %v1451_v34 = vpack.c.bf16 %v1438_v46, %v1437_v33  ;;  %v2527_v46 = vld [vmem:[#allocation5 + $0x30] sm:$0xff] }
 0x924   :  { %v1452_v22 = vpack.c.bf16 %v1440_v3, %v1439_v21 }
 0x92a   :  { %1566 = vmatmul.bf16.gmra.mxu1 %v1450_v30  ;;  %1615 = vmatmul.bf16.gmra.mxu2 %v1450_v30 }
 0x93a   :  { %1571 = vmatmul.bf16.gmra.mxu1 %v1451_v34  ;;  %1620 = vmatmul.bf16.gmra.mxu2 %v1451_v34  ;;  %v2528_v34 = vld [vmem:[#allocation5 + $0x38] sm:$0xff] }
 0x94a   :  { %1576 = vmatmul.bf16.gmra.mxu1 %v1452_v22  ;;  %1625 = vmatmul.bf16.gmra.mxu2 %v1452_v22 }
 0x95a   :  { %1581 = vmatmul.bf16.gmra.mxu1 %v1453_v0  ;;  %1630 = vmatmul.bf16.gmra.mxu2 %v1453_v0 }
 0x96a   :  { %1586 = vmatmul.bf16.gmra.mxu1 %v1454_v49  ;;  %1635 = vmatmul.bf16.gmra.mxu2 %v1454_v49 }
 0x97a   :  { %1591 = vmatmul.bf16.gmra.mxu1 %v1455_v44  ;;  %1640 = vmatmul.bf16.gmra.mxu2 %v1455_v44 }
 0x98a   :  { %1596 = vmatmul.bf16.gmra.mxu1 %v1456_v35  ;;  %1645 = vmatmul.bf16.gmra.mxu2 %v1456_v35 }
 0x997   :  { %v1562_v38 = vpop.f32.mrf.mxu1 }
 0x99d   :  { %v3263_v43 = vpop.f32.mrf.mxu2 }
 0x99f   :  { %v1564_v24 = vpop.f32.mrf.mxu1 }
 0x9a0   :  { %v1651_v33 = vpack.c.bf16 %v1564_v24, %v1562_v38 }
 0x9a5   :  { %v1613_v48 = vpop.f32.mrf.mxu2 }
 0x9a6   :  { %v1652_v42 = vpack.c.bf16 %v1613_v48, %v3263_v43 }
 0x9a7   :  { %v1567_v26 = vpop.f32.mrf.mxu1 }
 0x9ad   :  { %v1616_v29 = vpop.f32.mrf.mxu2 }
 0x9af   :  { %v1569_v58 = vpop.f32.mrf.mxu1 }
 0x9b0   :  { %v1653_v55 = vpack.c.bf16 %v1569_v58, %v1567_v26 }
 0x9b5   :  { %v1618_v4 = vpop.f32.mrf.mxu2 }
 0x9b6   :  { %v1654_v10 = vpack.c.bf16 %v1618_v4, %v1616_v29 }
 0x9b7   :  { %v1572_v63 = vpop.f32.mrf.mxu1 }
 0x9bd   :  { %v1621_v1 = vpop.f32.mrf.mxu2 }
 0x9bf   :  { %v1574_v11 = vpop.f32.mrf.mxu1 }
 0x9c0   :  { %v1655_v62 = vpack.c.bf16 %v1574_v11, %v1572_v63 }
 0x9c5   :  { %v1623_v5 = vpop.f32.mrf.mxu2 }
 0x9c6   :  { %v1656_v40 = vpack.c.bf16 %v1623_v5, %v1621_v1 }
 0x9c7   :  { %v1577_v47 = vpop.f32.mrf.mxu1 }
 0x9cd   :  { %v1626_v36 = vpop.f32.mrf.mxu2 }
 0x9cf   :  { %v1579_v37 = vpop.f32.mrf.mxu1 }
 0x9d0   :  { %v1657_v14 = vpack.c.bf16 %v1579_v37, %v1577_v47 }
 0x9d5   :  { %v1628_v18 = vpop.f32.mrf.mxu2 }
 0x9d6   :  { %v1658_v2 = vpack.c.bf16 %v1628_v18, %v1626_v36 }
 0x9d7   :  { %v1582_v39 = vpop.f32.mrf.mxu1 }
 0x9dd   :  { %v1631_v7 = vpop.f32.mrf.mxu2 }
 0x9df   :  { %v1584_v19 = vpop.f32.mrf.mxu1 }
 0x9e0   :  { %v1659_v35 = vpack.c.bf16 %v1584_v19, %v1582_v39 }
 0x9e5   :  { %v1633_v23 = vpop.f32.mrf.mxu2 }
 0x9e6   :  { %v1660_v15 = vpack.c.bf16 %v1633_v23, %v1631_v7 }
 0x9e7   :  { %v1587_v41 = vpop.f32.mrf.mxu1 }
 0x9ed   :  { %v1636_v25 = vpop.f32.mrf.mxu2 }
 0x9ef   :  { %v1589_v8 = vpop.f32.mrf.mxu1 }
 0x9f0   :  { %v1661_v9 = vpack.c.bf16 %v1589_v8, %v1587_v41 }
 0x9f5   :  { %v1638_v0 = vpop.f32.mrf.mxu2 }
 0x9f6   :  { %v1662_v30 = vpack.c.bf16 %v1638_v0, %v1636_v25 }
 0x9f7   :  { %v1592_v59 = vpop.f32.mrf.mxu1 }
 0x9fd   :  { %v1641_v56 = vpop.f32.mrf.mxu2 }
 0x9ff   :  { %v1594_v6 = vpop.f32.mrf.mxu1 }
 0xa00   :  { %v1663_v32 = vpack.c.bf16 %v1594_v6, %v1592_v59 }
 0xa05   :  { %v1643_v49 = vpop.f32.mrf.mxu2 }
 0xa06   :  { %v1664_v50 = vpack.c.bf16 %v1643_v49, %v1641_v56 }
 0xa07   :  { %v1597_v20 = vpop.f32.mrf.mxu1 }
 0xa0d   :  { %v1646_v16 = vpop.f32.mrf.mxu2 }
 0xa0f   :  { %v1599_v31 = vpop.f32.mrf.mxu1 }
 0xa10   :  { %v1665_v45 = vpack.c.bf16 %v1599_v31, %v1597_v20 }
 0xa12   :  { %1667 = vmatpush.bf16.msrb.mxu0 %v1665_v45 }
 0xa15   :  { %v1648_v27 = vpop.f32.mrf.mxu2 }
 0xa16   :  { %v1666_v44 = vpack.c.bf16 %v1648_v27, %v1646_v16  ;;  %1668 = vmatpush.bf16.msrb.mxu0 %v1663_v32 }
 0xa18   :  { %1716 = vmatpush.bf16.msrb.mxu3 %v1666_v44 }
 0xa1a   :  { %1669 = vmatpush.bf16.msrb.mxu0 %v1661_v9  ;;  %v1868_v9 = vld [vmem:[#allocation14] sm:$0xff] }
 0xa1b   :  { %1884 = vmatpush.xpose.msra.mxu2 %v1868_v9 }
 0xa1c   :  { %1717 = vmatpush.bf16.msrb.mxu3 %v1664_v50 }
 0xa1e   :  { %1670 = vmatpush.bf16.msrb.mxu0 %v1659_v35 }
 0xa20   :  { %1718 = vmatpush.bf16.msrb.mxu3 %v1662_v30 }
 0xa22   :  { %1671 = vmatpush.bf16.msrb.mxu0 %v1657_v14 }
 0xa24   :  { %1719 = vmatpush.bf16.msrb.mxu3 %v1660_v15 }
 0xa26   :  { %1672 = vmatpush.bf16.msrb.mxu0 %v1655_v62 }
 0xa28   :  { %1720 = vmatpush.bf16.msrb.mxu3 %v1658_v2 }
 0xa2a   :  { %1673 = vmatpush.bf16.msrb.mxu0 %v1653_v55 }
 0xa2c   :  { %1721 = vmatpush.bf16.msrb.mxu3 %v1656_v40 }
 0xa2e   :  { %1674 = vmatpush.bf16.msrb.mxu0 %v1651_v33 }
 0xa30   :  { %1722 = vmatpush.bf16.msrb.mxu3 %v1654_v10 }
 0xa31   :  { %1675 = vmatmul.bf16.vlgmr.msrb.gmra.mxu0 %v3094_v51 }
 0xa34   :  { %1723 = vmatpush.bf16.msrb.mxu3 %v1652_v42 }
 0xa37   :  { %1724 = vmatmul.bf16.vlgmr.msrb.gmra.mxu3 %v3094_v51 }
 0xa41   :  { %1680 = vmatmul.bf16.gmra.mxu0 %v3098_v57 }
 0xa47   :  { %1729 = vmatmul.bf16.gmra.mxu3 %v3098_v57 }
 0xa51   :  { %1685 = vmatmul.bf16.gmra.mxu0 %v3103_v53 }
 0xa57   :  { %1734 = vmatmul.bf16.gmra.mxu3 %v3103_v53 }
 0xa61   :  { %1690 = vmatmul.bf16.gmra.mxu0 %v3119_v60 }
 0xa67   :  { %1739 = vmatmul.bf16.gmra.mxu3 %v3119_v60 }
 0xa71   :  { %1695 = vmatmul.bf16.gmra.mxu0 %v3122_v12 }
 0xa77   :  { %1744 = vmatmul.bf16.gmra.mxu3 %v3122_v12 }
 0xa81   :  { %1700 = vmatmul.bf16.gmra.mxu0 %v3125_v13 }
 0xa87   :  { %1749 = vmatmul.bf16.gmra.mxu3 %v3125_v13 }
 0xa91   :  { %1705 = vmatmul.bf16.gmra.mxu0 %v2527_v46 }
 0xa97   :  { %1754 = vmatmul.bf16.gmra.mxu3 %v2527_v46 }
 0xaa1   :  { %1710 = vmatmul.bf16.gmra.mxu0 %v2528_v34 }
 0xaa7   :  { %1759 = vmatmul.bf16.gmra.mxu3 %v2528_v34 }
 0xaae   :  { %v3283_v37 = vpop.f32.mrf.mxu0 }
 0xab6   :  { %v3286_v18 = vpop.f32.mrf.mxu0 }
 0xab7   :  { %v1822_v59 = vadd.f32 %v3286_v18, %v3283_v37 }
 0xaba   :  { %v1725_v61 = vpop.f32.mrf.mxu3 }
 0xabe   :  { %v3288_v2 = vpop.f32.mrf.mxu0 }
 0xabf   :  { %v1823_v6 = vadd.f32 %v1822_v59, %v3288_v2 }
 0xac2   :  { %v1727_v52 = vpop.f32.mrf.mxu3 }
 0xac3   :  { %v1765_v17 = vpack.c.bf16 %v1727_v52, %v1725_v61 }
 0xac6   :  { %v3290_v39 = vpop.f32.mrf.mxu0 }
 0xac7   :  { %v1824_v20 = vadd.f32 %v1823_v6, %v3290_v39 }
 0xaca   :  { %v1730_v54 = vpop.f32.mrf.mxu3 }
 0xad2   :  { %v1732_v21 = vpop.f32.mrf.mxu3 }
 0xad3   :  { %v1766_v3 = vpack.c.bf16 %v1732_v21, %v1730_v54 }
 0xada   :  { %v1735_v22 = vpop.f32.mrf.mxu3 }
 0xae2   :  { %v1737_v38 = vpop.f32.mrf.mxu3 }
 0xae3   :  { %v1767_v43 = vpack.c.bf16 %v1737_v38, %v1735_v22 }
 0xaea   :  { %v1740_v24 = vpop.f32.mrf.mxu3 }
 0xaf2   :  { %v1742_v48 = vpop.f32.mrf.mxu3 }
 0xaf3   :  { %v1768_v42 = vpack.c.bf16 %v1742_v48, %v1740_v24 }
 0xafa   :  { %v1745_v26 = vpop.f32.mrf.mxu3 }
 0xb02   :  { %v1747_v29 = vpop.f32.mrf.mxu3 }
 0xb03   :  { %v1769_v36 = vpack.c.bf16 %v1747_v29, %v1745_v26 }
 0xb0a   :  { %v1750_v58 = vpop.f32.mrf.mxu3 }
 0xb12   :  { %v1752_v4 = vpop.f32.mrf.mxu3 }
 0xb13   :  { %v1770_v47 = vpack.c.bf16 %v1752_v4, %v1750_v58 }
 0xb1a   :  { %v1755_v10 = vpop.f32.mrf.mxu3 }
 0xb22   :  { %v1757_v63 = vpop.f32.mrf.mxu3 }
 0xb23   :  { %v1771_v40 = vpack.c.bf16 %v1757_v63, %v1755_v10 }
 0xb2a   :  { %v1760_v1 = vpop.f32.mrf.mxu3 }
 0xb32   :  { %v1762_v11 = vpop.f32.mrf.mxu3 }
 0xb33   :  { %v1772_v5 = vpack.c.bf16 %v1762_v11, %v1760_v1 }
 0xb35   :  { %1773 = vmatpush.bf16.msrb.mxu1 %v1772_v5 }
 0xb39   :  { %1774 = vmatpush.bf16.msrb.mxu1 %v1771_v40 }
 0xb3d   :  { %1775 = vmatpush.bf16.msrb.mxu1 %v1770_v47 }
 0xb41   :  { %1776 = vmatpush.bf16.msrb.mxu1 %v1769_v36 }
 0xb45   :  { %1777 = vmatpush.bf16.msrb.mxu1 %v1768_v42 }
 0xb49   :  { %1778 = vmatpush.bf16.msrb.mxu1 %v1767_v43 }
 0xb4d   :  { %1779 = vmatpush.bf16.msrb.mxu1 %v1766_v3 }
 0xb51   :  { %1780 = vmatpush.bf16.msrb.mxu1 %v1765_v17 }
 0xb54   :  { %1781 = vmatmul.bf16.vlgmr.msrb.gmra.mxu1 %v3094_v51  ;;  %v3292_v51 = vpop.f32.mrf.mxu0 }
 0xb55   :  { %v1825_v16 = vadd.f32 %v1824_v20, %v3292_v51 }
 0xb64   :  { %1786 = vmatmul.bf16.gmra.mxu1 %v3098_v57 }
 0xb74   :  { %1791 = vmatmul.bf16.gmra.mxu1 %v3103_v53  ;;  %v3296_v53 = vpop.f32.mrf.mxu0 }
 0xb75   :  { %v1826_v32 = vadd.f32 %v1825_v16, %v3296_v53 }
 0xb84   :  { %1796 = vmatmul.bf16.gmra.mxu1 %v3119_v60 }
 0xb94   :  { %1801 = vmatmul.bf16.gmra.mxu1 %v3122_v12  ;;  %v3300_v12 = vpop.f32.mrf.mxu0 }
 0xb95   :  { %v1827_v27 = vadd.f32 %v1826_v32, %v3300_v12 }
 0xb9c   :  { %v3306_v19 = vpop.f32.mrf.mxu0 }
 0xb9d   :  { %v1828_v35 = vadd.f32 %v1827_v27, %v3306_v19 }
 0xba4   :  { %1806 = vmatmul.bf16.gmra.mxu1 %v3125_v13  ;;  %v3310_v41 = vpop.f32.mrf.mxu0 }
 0xba5   :  { %v1829_v30 = vadd.f32 %v1828_v35, %v3310_v41 }
 0xbac   :  { %v3314_v8 = vpop.f32.mrf.mxu0 }
 0xbad   :  { %v1830_v15 = vadd.f32 %v1829_v30, %v3314_v8 }
 0xbb4   :  { %1811 = vmatmul.bf16.gmra.mxu1 %v2527_v46  ;;  %v3320_v56 = vpop.f32.mrf.mxu0 }
 0xbb5   :  { %v1831_v55 = vadd.f32 %v1830_v15, %v3320_v56 }
 0xbbc   :  { %v3329_v45 = vpop.f32.mrf.mxu0 }
 0xbbd   :  { %v1832_v46 = vadd.f32 %v1831_v55, %v3329_v45 }
 0xbc4   :  { %1816 = vmatmul.bf16.gmra.mxu1 %v2528_v34  ;;  %v3335_v50 = vpop.f32.mrf.mxu0 }
 0xbc5   :  { %v1833_v17 = vadd.f32 %v1832_v46, %v3335_v50 }
 0xbcc   :  { %v3342_v62 = vpop.f32.mrf.mxu0 }
 0xbcd   :  { %v1834_v22 = vadd.f32 %v1833_v17, %v3342_v62 }
 0xbd1   :  { %v3294_v57 = vpop.f32.mrf.mxu1 }
 0xbd4   :  { %v3350_v61 = vpop.f32.mrf.mxu0 }
 0xbd5   :  { %v1835_v24 = vadd.f32 %v1834_v22, %v3350_v61 }
 0xbd9   :  { %v3298_v60 = vpop.f32.mrf.mxu1 }
 0xbda   :  { %v1844_v34 = vadd.f32 %v3298_v60, %v3294_v57 }
 0xbdc   :  { %v3364_v42 = vpop.f32.mrf.mxu0 }
 0xbdd   :  { %v1836_v58 = vadd.f32 %v1835_v24, %v3364_v42 }
 0xbdf   :  { %v1837_v63 = vrot.slane %v1836_v58, 4 }
 0xbe1   :  { %v3302_v7 = vpop.f32.mrf.mxu1  ;;  %v1838_v40 = vadd.f32 %v1837_v63, %v1836_v58 }
 0xbe2   :  { %v1845_v52 = vadd.f32 %v1844_v34, %v3302_v7 }
 0xbe3   :  { %v1839_v59 = vrot.slane %v1838_v40, 2 }
 0xbe5   :  { %v1840_v16 = vadd.f32 %v1839_v59, %v1838_v40 }
 0xbe7   :  { %v1841_v9 = vrot.slane %v1840_v16, 1 }
 0xbe9   :  { %v3304_v13 = vpop.f32.mrf.mxu1  ;;  %v1842_v15 = vadd.f32 %v1841_v9, %v1840_v16 }
 0xbea   :  { %v1846_v21 = vadd.f32 %v1845_v52, %v3304_v13 }
 0xbeb   :  { %v1843_v34 = vmul.f32 0.020833334, %v1842_v15 }
 0xbf1   :  { %v3308_v23 = vpop.f32.mrf.mxu1 }
 0xbf2   :  { %v1847_v3 = vadd.f32 %v1846_v21, %v3308_v23 }
 0xbf9   :  { %v3312_v25 = vpop.f32.mrf.mxu1 }
 0xbfa   :  { %v1848_v38 = vadd.f32 %v1847_v3, %v3312_v25  ;;  %v1892_v3 = vld [vmem:[#allocation14 + $0x8] sm:$0xff] }
 0xbfb   :  { %1911 = vmatpush.msrb.mxu2 %v1892_v3 }
 0xc01   :  { %v3316_v0 = vpop.f32.mrf.mxu1 }
 0xc02   :  { %v1849_v43 = vadd.f32 %v1848_v38, %v3316_v0 }
 0xc09   :  { %v3323_v49 = vpop.f32.mrf.mxu1 }
 0xc0a   :  { %v1850_v26 = vadd.f32 %v1849_v43, %v3323_v49 }
 0xc11   :  { %v3327_v31 = vpop.f32.mrf.mxu1 }
 0xc12   :  { %v1851_v29 = vadd.f32 %v1850_v26, %v3327_v31 }
 0xc19   :  { %v3333_v44 = vpop.f32.mrf.mxu1 }
 0xc1a   :  { %v1852_v4 = vadd.f32 %v1851_v29, %v3333_v44 }
 0xc21   :  { %v3339_v14 = vpop.f32.mrf.mxu1 }
 0xc22   :  { %v1853_v10 = vadd.f32 %v1852_v4, %v3339_v14 }
 0xc29   :  { %v3345_v33 = vpop.f32.mrf.mxu1 }
 0xc2a   :  { %v1854_v11 = vadd.f32 %v1853_v10, %v3345_v33 }
 0xc31   :  { %v3354_v54 = vpop.f32.mrf.mxu1 }
 0xc32   :  { %v1855_v5 = vadd.f32 %v1854_v11, %v3354_v54 }
 0xc39   :  { %v3362_v48 = vpop.f32.mrf.mxu1 }
 0xc3a   :  { %v1856_v47 = vadd.f32 %v1855_v5, %v3362_v48 }
 0xc41   :  { %v3371_v1 = vpop.f32.mrf.mxu1 }
 0xc42   :  { %v1857_v36 = vadd.f32 %v1856_v47, %v3371_v1 }
 0xc49   :  { %v3377_v6 = vpop.f32.mrf.mxu1 }
 0xc4a   :  { %v1858_v20 = vadd.f32 %v1857_v36, %v3377_v6 }
 0xc4c   :  { %v1859_v32 = vrot.slane %v1858_v20, 4 }
 0xc4e   :  { %v1860_v27 = vadd.f32 %v1859_v32, %v1858_v20 }
 0xc50   :  { %v1861_v35 = vrot.slane %v1860_v27, 2 }
 0xc52   :  { %v1862_v30 = vadd.f32 %v1861_v35, %v1860_v27 }
 0xc54   :  { %v1863_v55 = vrot.slane %v1862_v30, 1 }
 0xc56   :  { %v1864_v46 = vadd.f32 %v1863_v55, %v1862_v30 }
 0xc58   :  { %v1865_v52 = vmul.f32 0.020833334, %v1864_v46 }
 0xc5a   :  { %v1866_v17 = vsel %vm724_vm0, %v1843_v34, %v1865_v52 }
 0xc5b   :  { %v1867_v21 = vsel %vm728_vm1, 1.0, %v1866_v17 }
 0xc5c   :  { %1885 = vmatmul.f32.vlgmr.msra.gmra.mxu2 %v1867_v21 }
 0xcdf   :  { %v1886_v22 = vpop.f32.mrf.mxu2 }
 0xce0   :  { %v1889_v38 = vmax.f32 %v1886_v22, 0.0 }
 0xce2   :  { %v1890_v43 = vsel %vm752_vm2, 1.0, %v1889_v38 }
 0xce3   :  { %2295 = vmatmul.msk.f32.vlgmr.msrb.gmra.mxu2 %vm756_vm3, %v1890_v43 }
 0xd66   :  { %v1913_v24 = vpop.f32.mrf.mxu2 }
 0xd67   :  { %v1916_v26 = vsel %vm780_vm4, %v1913_v24, -inf }
 0xd68   :  { %v1917_v29 = vrot.slane %v1916_v26, 4 }
 0xd6a   :  { %v1918_v58 = vmax.f32 %v1916_v26, %v1917_v29 }
 0xd6c   :  { %v1919_v4 = vrot.slane %v1918_v58, 2 }
 0xd6e   :  { %v1920_v10 = vmax.f32 %v1918_v58, %v1919_v4 }
 0xd70   :  { %v1921_v63 = vrot.slane %v1920_v10, 1 }
 0xd72   :  { %v1922_v11 = vmax.f32 %v1920_v10, %v1921_v63 }
 0xd74   :  { %v1923_v5 = vsub.f32 %v1913_v24, %v1922_v11 }
 0xd76   :  { %v1924_v40 = vmul.f32 1.442695, %v1923_v5 }
 0xd78   :  { %2517 = vpow2.f32 %v1924_v40 }
 0xd7e   :  { %v2518_v47 = vpop.eup %2517 }
 0xd7f   :  { %v1926_v36 = vsel %vm780_vm4, %v2518_v47, 0.0 }
 0xd80   :  { %v1927_v59 = vrot.slane %v1926_v36, 4 }
 0xd82   :  { %v1928_v28 = vadd.f32 %v1927_v59, %v1926_v36 }
 0xd84   :  { %v1929_v20 = vrot.slane %v1928_v28, 2 }
 0xd86   :  { %v1930_v16 = vadd.f32 %v1929_v20, %v1928_v28 }
 0xd88   :  { %v1931_v32 = vrot.slane %v1930_v16, 1 }
 0xd8a   :  { %v1932_v27 = vadd.f32 %v1931_v32, %v1930_v16 }
 0xd8c   :  { %2519 = vrcp.f32 %v1932_v27  ;;  %v1944_v15 = vand.u32 2147483648, %v1932_v27  ;;  %v1942_v46 = vand.u32 2147483647, %v1932_v27  ;;  %vm1938_vm1 = vweird.f32 %v1932_v27 }
 0xd8e   :  { %v1945_v52 = vor.u32 1.1754944e-38, %v1944_v15  ;;  %vm1943_vm3 = vcmp.eq.f32.partialorder %v1942_v46, 8.507059e+37 }
 0xd92   :  { %v2520_v9 = vpop.eup %2519 }
 0xd93   :  { %v1934_v35 = vmul.f32 %v2520_v9, %v1932_v27  ;;  %vm1939_vm0 = vweird.f32 %v2520_v9 }
 0xd94   :  { %vm1940_vm2 = vmor %vm1938_vm1, %vm1939_vm0 }
 0xd95   :  { %v1935_v30 = vsub.f32 1.0, %v1934_v35 }
 0xd97   :  { %v1936_v55 = vmul.f32 %v2520_v9, %v1935_v30 }
 0xd99   :  { %v1937_v34 = vadd.f32 %v2520_v9, %v1936_v55 }
 0xd9b   :  { %v1941_v17 = vsel %vm1940_vm2, %v2520_v9, %v1937_v34 }
 0xd9c   :  { %v1946_v21 = vsel %vm1943_vm3, %v1945_v52, %v1941_v17 }
 0xd9d   :  { %v1947_v3 = vmul.f32 %v2518_v47, %v1946_v21 }
 0xd9f   :  { %v1948_v22 = vperm.slane %v1947_v3, 0  ;;  %v1965_v38 = vperm.slane %v1947_v3, 1 }
 0xda1   :  { %v1949_v43 = vmul.f32 %v1948_v22, %v3283_v37  ;;  %v1950_v24 = vmul.f32 %v1948_v22, %v3286_v18  ;;  %v1951_v26 = vmul.f32 %v1948_v22, %v3288_v2  ;;  %v1966_v29 = vmul.f32 %v1965_v38, %v3294_v57 }
 0xda2   :  { %v1967_v58 = vmul.f32 %v1965_v38, %v3298_v60  ;;  %v1968_v4 = vmul.f32 %v1965_v38, %v3302_v7  ;;  %v1952_v10 = vmul.f32 %v1948_v22, %v3290_v39  ;;  %v1969_v63 = vmul.f32 %v1965_v38, %v3304_v13 }
 0xda3   :  { %v1953_v11 = vmul.f32 %v1948_v22, %v3292_v51  ;;  %v1970_v5 = vmul.f32 %v1965_v38, %v3308_v23  ;;  %v1954_v37 = vmul.f32 %v1948_v22, %v3296_v53  ;;  %v1955_v18 = vmul.f32 %v1948_v22, %v3300_v12 }
 0xda4   :  { %v1971_v2 = vmul.f32 %v1965_v38, %v3312_v25  ;;  %v1972_v57 = vmul.f32 %v1965_v38, %v3316_v0  ;;  %v1982_v40 = vadd.f32 %v1966_v29, %v1949_v43  ;;  %v1983_v60 = vadd.f32 %v1967_v58, %v1950_v24 }
 0xda5   :  { %v1984_v47 = vadd.f32 %v1968_v4, %v1951_v26  ;;  %v1956_v7 = vmul.f32 %v1948_v22, %v3306_v19  ;;  %v1973_v39 = vmul.f32 %v1965_v38, %v3323_v49  ;;  %v1985_v13 = vadd.f32 %v1969_v63, %v1952_v10 }
 0xda6   :  { %v1957_v51 = vmul.f32 %v1948_v22, %v3310_v41  ;;  %v1974_v23 = vmul.f32 %v1965_v38, %v3327_v31  ;;  %v1986_v36 = vadd.f32 %v1970_v5, %v1953_v11  ;;  %1998 = vst [vmem:[#allocation16] sm:$0xff] %v1982_v40  ;;  %v1958_v53 = vmul.f32 %v1948_v22, %v3314_v8 }
 0xda7   :  { %v1975_v12 = vmul.f32 %v1965_v38, %v3333_v44  ;;  %v1987_v25 = vadd.f32 %v1971_v2, %v1954_v37  ;;  %1999 = vst [vmem:[#allocation16 + $0x8] sm:$0xff] %v1983_v60  ;;  %v1959_v0 = vmul.f32 %v1948_v22, %v3320_v56  ;;  %v1976_v59 = vmul.f32 %v1965_v38, %v3339_v14 }
 0xda8   :  { %v1988_v19 = vadd.f32 %v1972_v57, %v1955_v18  ;;  %2000 = vst [vmem:[#allocation16 + $0x10] sm:$0xff] %v1984_v47  ;;  %v1960_v49 = vmul.f32 %v1948_v22, %v3329_v45  ;;  %v1977_v41 = vmul.f32 %v1965_v38, %v3345_v33  ;;  %v1989_v28 = vadd.f32 %v1973_v39, %v1956_v7 }
 0xda9   :  { %2001 = vst [vmem:[#allocation16 + $0x18] sm:$0xff] %v1985_v13  ;;  %v1961_v31 = vmul.f32 %v1948_v22, %v3335_v50  ;;  %v1978_v8 = vmul.f32 %v1965_v38, %v3354_v54  ;;  %v1990_v20 = vadd.f32 %v1974_v23, %v1957_v51  ;;  %v1962_v44 = vmul.f32 %v1948_v22, %v3342_v62 }
 0xdaa   :  { %2002 = vst [vmem:[#allocation16 + $0x20] sm:$0xff] %v1986_v36  ;;  %v1979_v56 = vmul.f32 %v1965_v38, %v3362_v48  ;;  %v1991_v16 = vadd.f32 %v1975_v12, %v1958_v53  ;;  %v1963_v14 = vmul.f32 %v1948_v22, %v3350_v61  ;;  %v1980_v45 = vmul.f32 %v1965_v38, %v3371_v1 }
 0xdab   :  { %2003 = vst [vmem:[#allocation16 + $0x28] sm:$0xff] %v1987_v25  ;;  %v1992_v32 = vadd.f32 %v1976_v59, %v1959_v0  ;;  %v1964_v33 = vmul.f32 %v1948_v22, %v3364_v42  ;;  %v1981_v50 = vmul.f32 %v1965_v38, %v3377_v6  ;;  %v1993_v27 = vadd.f32 %v1977_v41, %v1960_v49 }
 0xdac   :  { %2004 = vst [vmem:[#allocation16 + $0x30] sm:$0xff] %v1988_v19  ;;  %v1994_v54 = vadd.f32 %v1978_v8, %v1961_v31  ;;  %v1995_v9 = vadd.f32 %v1979_v56, %v1962_v44  ;;  %v1996_v62 = vadd.f32 %v1980_v45, %v1963_v14 }
 0xdad   :  { %2005 = vst [vmem:[#allocation16 + $0x38] sm:$0xff] %v1989_v28  ;;  %v1997_v61 = vadd.f32 %v1981_v50, %v1964_v33 }
 0xdae   :  { %2006 = vst [vmem:[#allocation16 + $0x40] sm:$0xff] %v1990_v20 }
 0xdaf   :  { %2007 = vst [vmem:[#allocation16 + $0x48] sm:$0xff] %v1991_v16 }
 0xdb0   :  { %2008 = vst [vmem:[#allocation16 + $0x50] sm:$0xff] %v1992_v32 }
 0xdb1   :  { %2009 = vst [vmem:[#allocation16 + $0x58] sm:$0xff] %v1993_v27 }
 0xdb2   :  { %2010 = vst [vmem:[#allocation16 + $0x60] sm:$0xff] %v1994_v54 }
 0xdb3   :  { %2011 = vst [vmem:[#allocation16 + $0x68] sm:$0xff] %v1995_v9 }
 0xdb4   :  { %2012 = vst [vmem:[#allocation16 + $0x70] sm:$0xff] %v1996_v62 }
 0xdb5   :  { %2013 = vst [vmem:[#allocation16 + $0x78] sm:$0xff] %v1997_v61 }
 0xdb6   :  { %2026 = dma.vmem_to_hbm [thread:$0]  %s2019_s21, 2048, %s2021_s3, [#allocation4], %s2761_s1, %s2761_s1, %s2762_s20  }
 0xdb7   :  { %2755 = dma.done.wait [#allocation4], 2048  }
 0xdb8   :  { %2756 = vsyncadd [#allocation4], 4294965248 }
 0xdb9   :  { %2031 = vsyncpa [#allocation3], 1 }
 0xdba   :  { %2032 = vsyncpa [#allocation6], 1 }
 0xdbb   :  { %2033 = vsyncpa [#allocation9], 1 }
 0xdbc   :  { %2034 = vsyncpa [#allocation12], 1 }
 0xdbd   :  { %2035 = vsyncpa [#allocation15], 1 }
 0xdbe   :  { %2036 = vsyncpa [#allocation4], 1 }

</bundles_post_ra>
